<compile_context>
chip_gen: v5e
topology: v5e:2x2
jax: 0.10.0
libtpu: 0.0.40
codegen_flags: <defaults>
</compile_context>

<pallas_src>
import functools
import math

import numpy as np

import jax
import jax.numpy as jnp
from jax.experimental import pallas as pl
from jax.experimental.pallas import tpu as pltpu


# ----------------------------------------------------------------------------
# Fused decoder kernel (single grid step, everything stays in VMEM/vregs).
#   xseq_ref : (S*B, D)   scrambled input rows (row r = t*B + b)
#   wih1_ref : (D, 4*H1)
#   b1_ref   : (1, 4*H1)  b_ih1 + b_hh1
#   w2c_ref  : (H1+H2, 4*H1+4*H2) fused per-step weight:
#              [h1_t | h2_{t-1}] @ w2c = [h1_t@Whh1 | h1_t@Wih2 + h2_{t-1}@Whh2]
#   b2_ref   : (1, 4*H2)  b_ih2 + b_hh2
#   wout_ref : (1, H2) if F == 1 else (H2, F)
#   bout_ref : (1, F)
#   o_ref    : (B, S*F)   column t*F+f = output_layer(h2_t)[b, f]
# Gate order follows PyTorch: i, f, g, o.
# ----------------------------------------------------------------------------
def _decoder_kernel(xseq_ref, wih1_ref, b1_ref, w2c_ref, b2_ref,
                    wout_ref, bout_ref, o_ref, *, seq_len, n_features):
    S, F = seq_len, n_features
    B = o_ref.shape[0]
    H1 = wih1_ref.shape[1] // 4
    H2 = b2_ref.shape[1] // 4
    mm_dtype = w2c_ref.dtype                    # MXU operand dtype (f32 or bf16)

    w2c = w2c_ref[...]
    b2 = b2_ref[...]
    wout = wout_ref[...]
    bout = bout_ref[...]

    def lstm_cell(pre, c, H):
        # sigmoid(x) = 0.5*(1 + tanh(x/2)): ONE wide EUP pass covers all the
        # sigmoid gates; one tanh for g, one for tanh(c).  (3 EUP issues/cell.)
        sig = 0.5 * (jnp.tanh(0.5 * pre) + 1.0)
        i_g = sig[:, 0 * H:1 * H]
        f_g = sig[:, 1 * H:2 * H]
        g_g = jnp.tanh(pre[:, 2 * H:3 * H])
        o_g = sig[:, 3 * H:4 * H]
        c_new = f_g * c + i_g * g_g
        return o_g * jnp.tanh(c_new), c_new

    def project(h2):
        if F == 1:
            # VPU multiply + XLU lane reduction instead of an N=1 MXU matmul;
            # overlaps with the next step's fused matmul (different units).
            return jnp.sum(h2 * wout, axis=-1, keepdims=True) + bout
        return jnp.dot(h2.astype(mm_dtype), wout,
                       preferred_element_type=jnp.float32) + bout

    # Prologue: ALL of layer-1's input-side gates in one batched MXU matmul.
    gx1_all = jnp.dot(xseq_ref[...].astype(mm_dtype), wih1_ref[...],
                      preferred_element_type=jnp.float32) + b1_ref[...]

    # Layer-1 step 0 (h1_{-1} = 0  ->  no hidden-state matmul needed).
    h1, c1 = lstm_cell(gx1_all[0:B, :], jnp.zeros((B, H1), jnp.float32), H1)
    h2 = jnp.zeros((B, H2), jnp.float32)
    c2 = jnp.zeros((B, H2), jnp.float32)

    # Software-pipelined recurrences, fully unrolled at trace time (S small).
    # Each step issues ONE fused MXU matmul producing layer-1's hidden gates
    # for step t+1 and layer-2's full gate pre-activations for step t.
    for t in range(S):
        hcat = jnp.concatenate([h1, h2], axis=1)              # (B, H1+H2)
        gc = jnp.dot(hcat.astype(mm_dtype), w2c,
                     preferred_element_type=jnp.float32)       # (B, 4H1+4H2)
        # Layer-2 step t.
        h2, c2 = lstm_cell(gc[:, 4 * H1:] + b2, c2, H2)
        o_ref[:, t * F:(t + 1) * F] = project(h2).astype(o_ref.dtype)
        # Layer-1 step t+1 (runs one step ahead of layer 2).
        if t + 1 < S:
            h1, c1 = lstm_cell(
                gx1_all[(t + 1) * B:(t + 2) * B, :] + gc[:, :4 * H1], c1, H1)


# ----------------------------------------------------------------------------
# One-time host-side parameter preparation (all generations, incl. v5e).
# ----------------------------------------------------------------------------
def prepare_decoder_params(params, n_features, use_bf16_matmul=False):
    """Transpose weights, fuse biases, and build the fused per-step weight
    [[Whh1, Wih2], [0, Whh2]] so every pipeline step issues a single matmul.
    With use_bf16_matmul=True only MXU operands are bf16; accumulation, gate
    math and the recurrent state stay f32."""
    mm = jnp.bfloat16 if use_bf16_matmul else jnp.float32
    w_ih1 = np.asarray(params["w_ih1"], np.float32)
    w_hh1 = np.asarray(params["w_hh1"], np.float32)
    w_ih2 = np.asarray(params["w_ih2"], np.float32)
    w_hh2 = np.asarray(params["w_hh2"], np.float32)
    w_out = np.asarray(params["w_out"], np.float32)
    H1, H2, F = w_hh1.shape[1], w_hh2.shape[1], w_out.shape[0]

    # Fused per-step weight (zero block: h2 does not feed layer-1 gates).
    w2c = np.block([
        [w_hh1.T, w_ih2.T],
        [np.zeros((H2, 4 * H1), np.float32), w_hh2.T],
    ])                                                         # (H1+H2, 4H1+4H2)

    prep = {
        "wih1": jnp.asarray(w_ih1.T, mm),
        "b1": jnp.asarray(np.asarray(params["b_ih1"] + params["b_hh1"],
                                     np.float32)[None, :]),
        "w2c": jnp.asarray(w2c, mm),
        "b2": jnp.asarray(np.asarray(params["b_ih2"] + params["b_hh2"],
                                     np.float32)[None, :]),
        "bout": jnp.asarray(np.asarray(params["b_out"], np.float32)[None, :]),
    }
    if F == 1:
        prep["wout"] = jnp.asarray(w_out.reshape(1, -1), jnp.float32)   # VPU path
    else:
        prep["wout"] = jnp.asarray(w_out.T, mm)
    return prep


# ----------------------------------------------------------------------------
# Full Decoder forward (matches the PyTorch module semantics exactly).
# ----------------------------------------------------------------------------
def decoder_forward(prep, x, *, seq_len, n_features):
    B, _ = x.shape
    S, F = seq_len, n_features

    # torch `x.repeat(S, 1).reshape(B, S, D)` scramble resolved with STATIC
    # indices at trace time: row r = t*B + b of x_seq is x[(b*S + t) % B].
    src = np.array([(b * S + t) % B for t in range(S) for b in range(B)],
                   dtype=np.int32)
    x_seq = jnp.take(x, jnp.asarray(src), axis=0)              # (S*B, D)

    kernel = functools.partial(_decoder_kernel, seq_len=S, n_features=F)
    args = (x_seq, prep["wih1"], prep["b1"], prep["w2c"], prep["b2"],
            prep["wout"], prep["bout"])

    out = pl.pallas_call(
        kernel,
        out_shape=jax.ShapeDtypeStruct((B, S * F), jnp.float32),
        grid=(1,),
        in_specs=[pl.BlockSpec(a.shape, lambda i: (0, 0)) for a in args],
        out_specs=pl.BlockSpec((B, S * F), lambda i: (0, 0)),
        compiler_params=pltpu.CompilerParams(
            dimension_semantics=("arbitrary",),
            # Tiny working set (~200 KB of weights); explicit limit is just a
            # guard for scaled-up H and leaves headroom on v7x's 64 MiB VMEM.
            vmem_limit_bytes=32 * 1024 * 1024,
        ),
    )(*args)

    # Lane-dense (B, S*F) kernel output -> (B, S, F); no host-side transpose.
    return out.reshape(B, S, F)


# ----------------------------------------------------------------------------
# Pure-JAX reference (mirrors torch.nn.LSTM / nn.Linear math) for validation.
# ----------------------------------------------------------------------------
def _lstm_ref(x_bsd, w_ih, w_hh, b_ih, b_hh):
    B, S, _ = x_bsd.shape
    H = w_hh.shape[1]
    hi = jax.lax.Precision.HIGHEST
    h = jnp.zeros((B, H), jnp.float32)
    c = jnp.zeros((B, H), jnp.float32)
    ys = []
    for t in range(S):
        gates = (jnp.dot(x_bsd[:, t, :], w_ih.T, precision=hi)
                 + jnp.dot(h, w_hh.T, precision=hi) + b_ih + b_hh)
        i_g, f_g, g_g, o_g = jnp.split(gates, 4, axis=1)
        c = jax.nn.sigmoid(f_g) * c + jax.nn.sigmoid(i_g) * jnp.tanh(g_g)
        h = jax.nn.sigmoid(o_g) * jnp.tanh(c)
        ys.append(h)
    return jnp.stack(ys, axis=1)


def decoder_ref(params, x, seq_len, input_dim):
    B = x.shape[0]
    x_rep = jnp.tile(x, (seq_len, 1)).reshape(B, seq_len, input_dim)
    y1 = _lstm_ref(x_rep, params["w_ih1"], params["w_hh1"],
                   params["b_ih1"], params["b_hh1"])
    y2 = _lstm_ref(y1, params["w_ih2"], params["w_hh2"],
                   params["b_ih2"], params["b_hh2"])
    return jnp.dot(y2, params["w_out"].T,
                   precision=jax.lax.Precision.HIGHEST) + params["b_out"]


def init_params(key, input_dim, n_features):
    hidden_dim = 2 * input_dim
    ks = jax.random.split(key, 10)

    def u(k, shape, fan):
        bound = 1.0 / math.sqrt(fan)
        return jax.random.uniform(k, shape, jnp.float32, -bound, bound)

    return {
        # rnn1: LSTM(input_dim -> input_dim)
        "w_ih1": u(ks[0], (4 * input_dim, input_dim), input_dim),
        "w_hh1": u(ks[1], (4 * input_dim, input_dim), input_dim),
        "b_ih1": u(ks[2], (4 * input_dim,), input_dim),
        "b_hh1": u(ks[3], (4 * input_dim,), input_dim),
        # rnn2: LSTM(input_dim -> hidden_dim)
        "w_ih2": u(ks[4], (4 * hidden_dim, input_dim), hidden_dim),
        "w_hh2": u(ks[5], (4 * hidden_dim, hidden_dim), hidden_dim),
        "b_ih2": u(ks[6], (4 * hidden_dim,), hidden_dim),
        "b_hh2": u(ks[7], (4 * hidden_dim,), hidden_dim),
        # output_layer: Linear(hidden_dim -> n_features)
        "w_out": u(ks[8], (n_features, hidden_dim), hidden_dim),
        "b_out": u(ks[9], (n_features,), hidden_dim),
    }


if __name__ == "__main__":
    batch = 2
    seq_len = 8
    input_dim = 32
    n_features = 1

    root = jax.random.PRNGKey(0)
    k_param, k_x = jax.random.split(root)
    params = init_params(k_param, input_dim, n_features)

    # Decoder input: (batch, input_dim) latent vector (as implied by forward()).
    x = jax.random.normal(k_x, (batch, input_dim), jnp.float32)

    ref = decoder_ref(params, x, seq_len, input_dim)

    fwd = jax.jit(functools.partial(decoder_forward,
                                    seq_len=seq_len, n_features=n_features))

    # Default f32 MXU-operand path; tight tolerance (residual is only MXU
    # f32-pass precision vs the HIGHEST-precision reference).
    prep_f32 = prepare_decoder_params(params, n_features, use_bf16_matmul=False)
    out = jax.block_until_ready(fwd(prep_f32, x))
    assert out.shape == (batch, seq_len, n_features), out.shape
    assert jnp.allclose(out, ref, atol=1e-3, rtol=1e-3), (
        float(jnp.max(jnp.abs(out - ref))))

    # bf16 MXU-operand fast path (all generations); f32 accumulation/gate math.
    prep_bf16 = prepare_decoder_params(params, n_features, use_bf16_matmul=True)
    out_bf16 = jax.block_until_ready(fwd(prep_bf16, x))
    assert out_bf16.shape == (batch, seq_len, n_features), out_bf16.shape
    assert jnp.allclose(out_bf16, ref, atol=5e-2, rtol=5e-2), (
        float(jnp.max(jnp.abs(out_bf16 - ref))))

    print("KERNEL_OK")
</pallas_src>

<mosaic_0001>
module attributes {stable_mosaic.version = 11 : i64} {
  func.func @_decoder_kernel(%arg0: i32, %arg1: memref<16x32xf32, #tpu.memory_space<vmem>>, %arg2: memref<32x128xf32, #tpu.memory_space<vmem>>, %arg3: memref<1x128xf32, #tpu.memory_space<vmem>>, %arg4: memref<96x384xf32, #tpu.memory_space<vmem>>, %arg5: memref<1x256xf32, #tpu.memory_space<vmem>>, %arg6: memref<1x64xf32, #tpu.memory_space<vmem>>, %arg7: memref<1x1xf32, #tpu.memory_space<vmem>>, %arg8: memref<2x8xf32, #tpu.memory_space<vmem>>) attributes {dimension_semantics = [#tpu.dimension_semantics<arbitrary>], iteration_bounds = array<i64: 1>, scalar_prefetch = 0 : i64, scratch_operands = 0 : i64, tpu.core_type = #tpu.core_type<tc>, window_params = [{pipeline_mode = #tpu.pipeline_mode<synchronous>, transform_indices = @transform_0, window_bounds = array<i64: 16, 32>}, {pipeline_mode = #tpu.pipeline_mode<synchronous>, transform_indices = @transform_1, window_bounds = array<i64: 32, 128>}, {pipeline_mode = #tpu.pipeline_mode<synchronous>, transform_indices = @transform_2, window_bounds = array<i64: 1, 128>}, {pipeline_mode = #tpu.pipeline_mode<synchronous>, transform_indices = @transform_3, window_bounds = array<i64: 96, 384>}, {pipeline_mode = #tpu.pipeline_mode<synchronous>, transform_indices = @transform_4, window_bounds = array<i64: 1, 256>}, {pipeline_mode = #tpu.pipeline_mode<synchronous>, transform_indices = @transform_5, window_bounds = array<i64: 1, 64>}, {pipeline_mode = #tpu.pipeline_mode<synchronous>, transform_indices = @transform_6, window_bounds = array<i64: 1, 1>}, {pipeline_mode = #tpu.pipeline_mode<synchronous>, transform_indices = @transform_7, window_bounds = array<i64: 2, 8>}]} {
    %c0 = arith.constant 0 : index
    %c0_0 = arith.constant 0 : index
    %0 = vector.load %arg4[%c0, %c0_0] : memref<96x384xf32, #tpu.memory_space<vmem>>, vector<96x384xf32>
    %c0_1 = arith.constant 0 : index
    %c0_2 = arith.constant 0 : index
    %1 = vector.load %arg5[%c0_1, %c0_2] : memref<1x256xf32, #tpu.memory_space<vmem>>, vector<1x256xf32>
    %c0_3 = arith.constant 0 : index
    %c0_4 = arith.constant 0 : index
    %2 = vector.load %arg6[%c0_3, %c0_4] : memref<1x64xf32, #tpu.memory_space<vmem>>, vector<1x64xf32>
    %c0_5 = arith.constant 0 : index
    %c0_6 = arith.constant 0 : index
    %3 = vector.load %arg7[%c0_5, %c0_6] : memref<1x1xf32, #tpu.memory_space<vmem>>, vector<1x1xf32>
    %c0_7 = arith.constant 0 : index
    %c0_8 = arith.constant 0 : index
    %4 = vector.load %arg1[%c0_7, %c0_8] : memref<16x32xf32, #tpu.memory_space<vmem>>, vector<16x32xf32>
    %c0_9 = arith.constant 0 : index
    %c0_10 = arith.constant 0 : index
    %5 = vector.load %arg2[%c0_9, %c0_10] : memref<32x128xf32, #tpu.memory_space<vmem>>, vector<32x128xf32>
    %cst = arith.constant dense<0.000000e+00> : vector<16x128xf32>
    %6 = tpu.matmul %4, %5, %cst {dimension_numbers = #tpu.dot_dimension_numbers<[1], [0], [0], [1], [0, 0, 1, 1], [], []>} : vector<16x32xf32>, vector<32x128xf32>, vector<16x128xf32> -> vector<16x128xf32>
    %c0_11 = arith.constant 0 : index
    %c0_12 = arith.constant 0 : index
    %7 = vector.load %arg3[%c0_11, %c0_12] : memref<1x128xf32, #tpu.memory_space<vmem>>, vector<1x128xf32>
    %8 = vector.broadcast %7 : vector<1x128xf32> to vector<16x128xf32>
    %9 = arith.addf %6, %8 : vector<16x128xf32>
    %10 = vector.extract_strided_slice %9 {offsets = [0, 0], sizes = [2, 128], strides = [1, 1]} : vector<16x128xf32> to vector<2x128xf32>
    %cst_13 = arith.constant 0.000000e+00 : f32
    %11 = vector.broadcast %cst_13 : f32 to vector<2x32xf32>
    %cst_14 = arith.constant 5.000000e-01 : f32
    %12 = vector.broadcast %cst_14 : f32 to vector<2x128xf32>
    %13 = arith.mulf %12, %10 : vector<2x128xf32>
    %14 = math.tanh %13 : vector<2x128xf32>
    %cst_15 = arith.constant 1.000000e+00 : f32
    %15 = vector.broadcast %cst_15 : f32 to vector<2x128xf32>
    %16 = arith.addf %14, %15 : vector<2x128xf32>
    %cst_16 = arith.constant 5.000000e-01 : f32
    %17 = vector.broadcast %cst_16 : f32 to vector<2x128xf32>
    %18 = arith.mulf %17, %16 : vector<2x128xf32>
    %19 = vector.extract_strided_slice %18 {offsets = [0, 0], sizes = [2, 32], strides = [1, 1]} : vector<2x128xf32> to vector<2x32xf32>
    %20 = vector.extract_strided_slice %18 {offsets = [0, 32], sizes = [2, 32], strides = [1, 1]} : vector<2x128xf32> to vector<2x32xf32>
    %21 = vector.extract_strided_slice %10 {offsets = [0, 64], sizes = [2, 32], strides = [1, 1]} : vector<2x128xf32> to vector<2x32xf32>
    %22 = math.tanh %21 : vector<2x32xf32>
    %23 = vector.extract_strided_slice %18 {offsets = [0, 96], sizes = [2, 32], strides = [1, 1]} : vector<2x128xf32> to vector<2x32xf32>
    %24 = arith.mulf %20, %11 : vector<2x32xf32>
    %25 = arith.mulf %19, %22 : vector<2x32xf32>
    %26 = arith.addf %24, %25 : vector<2x32xf32>
    %27 = math.tanh %26 : vector<2x32xf32>
    %28 = arith.mulf %23, %27 : vector<2x32xf32>
    %cst_17 = arith.constant 0.000000e+00 : f32
    %29 = vector.broadcast %cst_17 : f32 to vector<2x64xf32>
    %cst_18 = arith.constant 0.000000e+00 : f32
    %30 = vector.broadcast %cst_18 : f32 to vector<2x64xf32>
    %31 = tpu.concatenate %28, %29 in 1 : vector<2x32xf32>, vector<2x64xf32> -> vector<2x96xf32>
    %cst_19 = arith.constant dense<0.000000e+00> : vector<2x384xf32>
    %32 = tpu.matmul %31, %0, %cst_19 {dimension_numbers = #tpu.dot_dimension_numbers<[1], [0], [0], [1], [0, 0, 1, 1], [], []>} : vector<2x96xf32>, vector<96x384xf32>, vector<2x384xf32> -> vector<2x384xf32>
    %33 = vector.extract_strided_slice %32 {offsets = [0, 128], sizes = [2, 256], strides = [1, 1]} : vector<2x384xf32> to vector<2x256xf32>
    %34 = vector.broadcast %1 : vector<1x256xf32> to vector<2x256xf32>
    %35 = arith.addf %33, %34 : vector<2x256xf32>
    %cst_20 = arith.constant 5.000000e-01 : f32
    %36 = vector.broadcast %cst_20 : f32 to vector<2x256xf32>
    %37 = arith.mulf %36, %35 : vector<2x256xf32>
    %38 = math.tanh %37 : vector<2x256xf32>
    %cst_21 = arith.constant 1.000000e+00 : f32
    %39 = vector.broadcast %cst_21 : f32 to vector<2x256xf32>
    %40 = arith.addf %38, %39 : vector<2x256xf32>
    %cst_22 = arith.constant 5.000000e-01 : f32
    %41 = vector.broadcast %cst_22 : f32 to vector<2x256xf32>
    %42 = arith.mulf %41, %40 : vector<2x256xf32>
    %43 = vector.extract_strided_slice %42 {offsets = [0, 0], sizes = [2, 64], strides = [1, 1]} : vector<2x256xf32> to vector<2x64xf32>
    %44 = vector.extract_strided_slice %42 {offsets = [0, 64], sizes = [2, 64], strides = [1, 1]} : vector<2x256xf32> to vector<2x64xf32>
    %45 = vector.extract_strided_slice %35 {offsets = [0, 128], sizes = [2, 64], strides = [1, 1]} : vector<2x256xf32> to vector<2x64xf32>
    %46 = math.tanh %45 : vector<2x64xf32>
    %47 = vector.extract_strided_slice %42 {offsets = [0, 192], sizes = [2, 64], strides = [1, 1]} : vector<2x256xf32> to vector<2x64xf32>
    %48 = arith.mulf %44, %30 : vector<2x64xf32>
    %49 = arith.mulf %43, %46 : vector<2x64xf32>
    %50 = arith.addf %48, %49 : vector<2x64xf32>
    %51 = math.tanh %50 : vector<2x64xf32>
    %52 = arith.mulf %47, %51 : vector<2x64xf32>
    %53 = vector.broadcast %2 : vector<1x64xf32> to vector<2x64xf32>
    %54 = arith.mulf %52, %53 : vector<2x64xf32>
    %cst_23 = arith.constant dense<0.000000e+00> : vector<2xf32>
    %55 = vector.multi_reduction <add>, %54, %cst_23 [1] : vector<2x64xf32> to vector<2xf32>
    %56 = vector.shape_cast %55 : vector<2xf32> to vector<2x1xf32>
    %57 = vector.broadcast %3 : vector<1x1xf32> to vector<2x1xf32>
    %58 = arith.addf %56, %57 : vector<2x1xf32>
    %c0_24 = arith.constant 0 : index
    %c0_25 = arith.constant 0 : index
    %59 = vector.load %arg8[%c0_24, %c0_25] : memref<2x8xf32, #tpu.memory_space<vmem>>, vector<2x1xf32>
    tpu.vector_store %arg8[%c0_24, %c0_25], %58 {strides = array<i32>} : memref<2x8xf32, #tpu.memory_space<vmem>>, vector<2x1xf32>,
    %60 = vector.extract_strided_slice %9 {offsets = [2, 0], sizes = [2, 128], strides = [1, 1]} : vector<16x128xf32> to vector<2x128xf32>
    %61 = vector.extract_strided_slice %32 {offsets = [0, 0], sizes = [2, 128], strides = [1, 1]} : vector<2x384xf32> to vector<2x128xf32>
    %62 = arith.addf %60, %61 : vector<2x128xf32>
    %cst_26 = arith.constant 5.000000e-01 : f32
    %63 = vector.broadcast %cst_26 : f32 to vector<2x128xf32>
    %64 = arith.mulf %63, %62 : vector<2x128xf32>
    %65 = math.tanh %64 : vector<2x128xf32>
    %cst_27 = arith.constant 1.000000e+00 : f32
    %66 = vector.broadcast %cst_27 : f32 to vector<2x128xf32>
    %67 = arith.addf %65, %66 : vector<2x128xf32>
    %cst_28 = arith.constant 5.000000e-01 : f32
    %68 = vector.broadcast %cst_28 : f32 to vector<2x128xf32>
    %69 = arith.mulf %68, %67 : vector<2x128xf32>
    %70 = vector.extract_strided_slice %69 {offsets = [0, 0], sizes = [2, 32], strides = [1, 1]} : vector<2x128xf32> to vector<2x32xf32>
    %71 = vector.extract_strided_slice %69 {offsets = [0, 32], sizes = [2, 32], strides = [1, 1]} : vector<2x128xf32> to vector<2x32xf32>
    %72 = vector.extract_strided_slice %62 {offsets = [0, 64], sizes = [2, 32], strides = [1, 1]} : vector<2x128xf32> to vector<2x32xf32>
    %73 = math.tanh %72 : vector<2x32xf32>
    %74 = vector.extract_strided_slice %69 {offsets = [0, 96], sizes = [2, 32], strides = [1, 1]} : vector<2x128xf32> to vector<2x32xf32>
    %75 = arith.mulf %71, %26 : vector<2x32xf32>
    %76 = arith.mulf %70, %73 : vector<2x32xf32>
    %77 = arith.addf %75, %76 : vector<2x32xf32>
    %78 = math.tanh %77 : vector<2x32xf32>
    %79 = arith.mulf %74, %78 : vector<2x32xf32>
    %80 = tpu.concatenate %79, %52 in 1 : vector<2x32xf32>, vector<2x64xf32> -> vector<2x96xf32>
    %cst_29 = arith.constant dense<0.000000e+00> : vector<2x384xf32>
    %81 = tpu.matmul %80, %0, %cst_29 {dimension_numbers = #tpu.dot_dimension_numbers<[1], [0], [0], [1], [0, 0, 1, 1], [], []>} : vector<2x96xf32>, vector<96x384xf32>, vector<2x384xf32> -> vector<2x384xf32>
    %82 = vector.extract_strided_slice %81 {offsets = [0, 128], sizes = [2, 256], strides = [1, 1]} : vector<2x384xf32> to vector<2x256xf32>
    %83 = vector.broadcast %1 : vector<1x256xf32> to vector<2x256xf32>
    %84 = arith.addf %82, %83 : vector<2x256xf32>
    %cst_30 = arith.constant 5.000000e-01 : f32
    %85 = vector.broadcast %cst_30 : f32 to vector<2x256xf32>
    %86 = arith.mulf %85, %84 : vector<2x256xf32>
    %87 = math.tanh %86 : vector<2x256xf32>
    %cst_31 = arith.constant 1.000000e+00 : f32
    %88 = vector.broadcast %cst_31 : f32 to vector<2x256xf32>
    %89 = arith.addf %87, %88 : vector<2x256xf32>
    %cst_32 = arith.constant 5.000000e-01 : f32
    %90 = vector.broadcast %cst_32 : f32 to vector<2x256xf32>
    %91 = arith.mulf %90, %89 : vector<2x256xf32>
    %92 = vector.extract_strided_slice %91 {offsets = [0, 0], sizes = [2, 64], strides = [1, 1]} : vector<2x256xf32> to vector<2x64xf32>
    %93 = vector.extract_strided_slice %91 {offsets = [0, 64], sizes = [2, 64], strides = [1, 1]} : vector<2x256xf32> to vector<2x64xf32>
    %94 = vector.extract_strided_slice %84 {offsets = [0, 128], sizes = [2, 64], strides = [1, 1]} : vector<2x256xf32> to vector<2x64xf32>
    %95 = math.tanh %94 : vector<2x64xf32>
    %96 = vector.extract_strided_slice %91 {offsets = [0, 192], sizes = [2, 64], strides = [1, 1]} : vector<2x256xf32> to vector<2x64xf32>
    %97 = arith.mulf %93, %50 : vector<2x64xf32>
    %98 = arith.mulf %92, %95 : vector<2x64xf32>
    %99 = arith.addf %97, %98 : vector<2x64xf32>
    %100 = math.tanh %99 : vector<2x64xf32>
    %101 = arith.mulf %96, %100 : vector<2x64xf32>
    %102 = vector.broadcast %2 : vector<1x64xf32> to vector<2x64xf32>
    %103 = arith.mulf %101, %102 : vector<2x64xf32>
    %cst_33 = arith.constant dense<0.000000e+00> : vector<2xf32>
    %104 = vector.multi_reduction <add>, %103, %cst_33 [1] : vector<2x64xf32> to vector<2xf32>
    %105 = vector.shape_cast %104 : vector<2xf32> to vector<2x1xf32>
    %106 = vector.broadcast %3 : vector<1x1xf32> to vector<2x1xf32>
    %107 = arith.addf %105, %106 : vector<2x1xf32>
    %c0_34 = arith.constant 0 : index
    %c1 = arith.constant 1 : index
    %108 = vector.load %arg8[%c0_34, %c1] : memref<2x8xf32, #tpu.memory_space<vmem>>, vector<2x1xf32>
    tpu.vector_store %arg8[%c0_34, %c1], %107 {strides = array<i32>} : memref<2x8xf32, #tpu.memory_space<vmem>>, vector<2x1xf32>,
    %109 = vector.extract_strided_slice %9 {offsets = [4, 0], sizes = [2, 128], strides = [1, 1]} : vector<16x128xf32> to vector<2x128xf32>
    %110 = vector.extract_strided_slice %81 {offsets = [0, 0], sizes = [2, 128], strides = [1, 1]} : vector<2x384xf32> to vector<2x128xf32>
    %111 = arith.addf %109, %110 : vector<2x128xf32>
    %cst_35 = arith.constant 5.000000e-01 : f32
    %112 = vector.broadcast %cst_35 : f32 to vector<2x128xf32>
    %113 = arith.mulf %112, %111 : vector<2x128xf32>
    %114 = math.tanh %113 : vector<2x128xf32>
    %cst_36 = arith.constant 1.000000e+00 : f32
    %115 = vector.broadcast %cst_36 : f32 to vector<2x128xf32>
    %116 = arith.addf %114, %115 : vector<2x128xf32>
    %cst_37 = arith.constant 5.000000e-01 : f32
    %117 = vector.broadcast %cst_37 : f32 to vector<2x128xf32>
    %118 = arith.mulf %117, %116 : vector<2x128xf32>
    %119 = vector.extract_strided_slice %118 {offsets = [0, 0], sizes = [2, 32], strides = [1, 1]} : vector<2x128xf32> to vector<2x32xf32>
    %120 = vector.extract_strided_slice %118 {offsets = [0, 32], sizes = [2, 32], strides = [1, 1]} : vector<2x128xf32> to vector<2x32xf32>
    %121 = vector.extract_strided_slice %111 {offsets = [0, 64], sizes = [2, 32], strides = [1, 1]} : vector<2x128xf32> to vector<2x32xf32>
    %122 = math.tanh %121 : vector<2x32xf32>
    %123 = vector.extract_strided_slice %118 {offsets = [0, 96], sizes = [2, 32], strides = [1, 1]} : vector<2x128xf32> to vector<2x32xf32>
    %124 = arith.mulf %120, %77 : vector<2x32xf32>
    %125 = arith.mulf %119, %122 : vector<2x32xf32>
    %126 = arith.addf %124, %125 : vector<2x32xf32>
    %127 = math.tanh %126 : vector<2x32xf32>
    %128 = arith.mulf %123, %127 : vector<2x32xf32>
    %129 = tpu.concatenate %128, %101 in 1 : vector<2x32xf32>, vector<2x64xf32> -> vector<2x96xf32>
    %cst_38 = arith.constant dense<0.000000e+00> : vector<2x384xf32>
    %130 = tpu.matmul %129, %0, %cst_38 {dimension_numbers = #tpu.dot_dimension_numbers<[1], [0], [0], [1], [0, 0, 1, 1], [], []>} : vector<2x96xf32>, vector<96x384xf32>, vector<2x384xf32> -> vector<2x384xf32>
    %131 = vector.extract_strided_slice %130 {offsets = [0, 128], sizes = [2, 256], strides = [1, 1]} : vector<2x384xf32> to vector<2x256xf32>
    %132 = vector.broadcast %1 : vector<1x256xf32> to vector<2x256xf32>
    %133 = arith.addf %131, %132 : vector<2x256xf32>
    %cst_39 = arith.constant 5.000000e-01 : f32
    %134 = vector.broadcast %cst_39 : f32 to vector<2x256xf32>
    %135 = arith.mulf %134, %133 : vector<2x256xf32>
    %136 = math.tanh %135 : vector<2x256xf32>
    %cst_40 = arith.constant 1.000000e+00 : f32
    %137 = vector.broadcast %cst_40 : f32 to vector<2x256xf32>
    %138 = arith.addf %136, %137 : vector<2x256xf32>
    %cst_41 = arith.constant 5.000000e-01 : f32
    %139 = vector.broadcast %cst_41 : f32 to vector<2x256xf32>
    %140 = arith.mulf %139, %138 : vector<2x256xf32>
    %141 = vector.extract_strided_slice %140 {offsets = [0, 0], sizes = [2, 64], strides = [1, 1]} : vector<2x256xf32> to vector<2x64xf32>
    %142 = vector.extract_strided_slice %140 {offsets = [0, 64], sizes = [2, 64], strides = [1, 1]} : vector<2x256xf32> to vector<2x64xf32>
    %143 = vector.extract_strided_slice %133 {offsets = [0, 128], sizes = [2, 64], strides = [1, 1]} : vector<2x256xf32> to vector<2x64xf32>
    %144 = math.tanh %143 : vector<2x64xf32>
    %145 = vector.extract_strided_slice %140 {offsets = [0, 192], sizes = [2, 64], strides = [1, 1]} : vector<2x256xf32> to vector<2x64xf32>
    %146 = arith.mulf %142, %99 : vector<2x64xf32>
    %147 = arith.mulf %141, %144 : vector<2x64xf32>
    %148 = arith.addf %146, %147 : vector<2x64xf32>
    %149 = math.tanh %148 : vector<2x64xf32>
    %150 = arith.mulf %145, %149 : vector<2x64xf32>
    %151 = vector.broadcast %2 : vector<1x64xf32> to vector<2x64xf32>
    %152 = arith.mulf %150, %151 : vector<2x64xf32>
    %cst_42 = arith.constant dense<0.000000e+00> : vector<2xf32>
    %153 = vector.multi_reduction <add>, %152, %cst_42 [1] : vector<2x64xf32> to vector<2xf32>
    %154 = vector.shape_cast %153 : vector<2xf32> to vector<2x1xf32>
    %155 = vector.broadcast %3 : vector<1x1xf32> to vector<2x1xf32>
    %156 = arith.addf %154, %155 : vector<2x1xf32>
    %c0_43 = arith.constant 0 : index
    %c2 = arith.constant 2 : index
    %157 = vector.load %arg8[%c0_43, %c2] : memref<2x8xf32, #tpu.memory_space<vmem>>, vector<2x1xf32>
    tpu.vector_store %arg8[%c0_43, %c2], %156 {strides = array<i32>} : memref<2x8xf32, #tpu.memory_space<vmem>>, vector<2x1xf32>,
    %158 = vector.extract_strided_slice %9 {offsets = [6, 0], sizes = [2, 128], strides = [1, 1]} : vector<16x128xf32> to vector<2x128xf32>
    %159 = vector.extract_strided_slice %130 {offsets = [0, 0], sizes = [2, 128], strides = [1, 1]} : vector<2x384xf32> to vector<2x128xf32>
    %160 = arith.addf %158, %159 : vector<2x128xf32>
    %cst_44 = arith.constant 5.000000e-01 : f32
    %161 = vector.broadcast %cst_44 : f32 to vector<2x128xf32>
    %162 = arith.mulf %161, %160 : vector<2x128xf32>
    %163 = math.tanh %162 : vector<2x128xf32>
    %cst_45 = arith.constant 1.000000e+00 : f32
    %164 = vector.broadcast %cst_45 : f32 to vector<2x128xf32>
    %165 = arith.addf %163, %164 : vector<2x128xf32>
    %cst_46 = arith.constant 5.000000e-01 : f32
    %166 = vector.broadcast %cst_46 : f32 to vector<2x128xf32>
    %167 = arith.mulf %166, %165 : vector<2x128xf32>
    %168 = vector.extract_strided_slice %167 {offsets = [0, 0], sizes = [2, 32], strides = [1, 1]} : vector<2x128xf32> to vector<2x32xf32>
    %169 = vector.extract_strided_slice %167 {offsets = [0, 32], sizes = [2, 32], strides = [1, 1]} : vector<2x128xf32> to vector<2x32xf32>
    %170 = vector.extract_strided_slice %160 {offsets = [0, 64], sizes = [2, 32], strides = [1, 1]} : vector<2x128xf32> to vector<2x32xf32>
    %171 = math.tanh %170 : vector<2x32xf32>
    %172 = vector.extract_strided_slice %167 {offsets = [0, 96], sizes = [2, 32], strides = [1, 1]} : vector<2x128xf32> to vector<2x32xf32>
    %173 = arith.mulf %169, %126 : vector<2x32xf32>
    %174 = arith.mulf %168, %171 : vector<2x32xf32>
    %175 = arith.addf %173, %174 : vector<2x32xf32>
    %176 = math.tanh %175 : vector<2x32xf32>
    %177 = arith.mulf %172, %176 : vector<2x32xf32>
    %178 = tpu.concatenate %177, %150 in 1 : vector<2x32xf32>, vector<2x64xf32> -> vector<2x96xf32>
    %cst_47 = arith.constant dense<0.000000e+00> : vector<2x384xf32>
    %179 = tpu.matmul %178, %0, %cst_47 {dimension_numbers = #tpu.dot_dimension_numbers<[1], [0], [0], [1], [0, 0, 1, 1], [], []>} : vector<2x96xf32>, vector<96x384xf32>, vector<2x384xf32> -> vector<2x384xf32>
    %180 = vector.extract_strided_slice %179 {offsets = [0, 128], sizes = [2, 256], strides = [1, 1]} : vector<2x384xf32> to vector<2x256xf32>
    %181 = vector.broadcast %1 : vector<1x256xf32> to vector<2x256xf32>
    %182 = arith.addf %180, %181 : vector<2x256xf32>
    %cst_48 = arith.constant 5.000000e-01 : f32
    %183 = vector.broadcast %cst_48 : f32 to vector<2x256xf32>
    %184 = arith.mulf %183, %182 : vector<2x256xf32>
    %185 = math.tanh %184 : vector<2x256xf32>
    %cst_49 = arith.constant 1.000000e+00 : f32
    %186 = vector.broadcast %cst_49 : f32 to vector<2x256xf32>
    %187 = arith.addf %185, %186 : vector<2x256xf32>
    %cst_50 = arith.constant 5.000000e-01 : f32
    %188 = vector.broadcast %cst_50 : f32 to vector<2x256xf32>
    %189 = arith.mulf %188, %187 : vector<2x256xf32>
    %190 = vector.extract_strided_slice %189 {offsets = [0, 0], sizes = [2, 64], strides = [1, 1]} : vector<2x256xf32> to vector<2x64xf32>
    %191 = vector.extract_strided_slice %189 {offsets = [0, 64], sizes = [2, 64], strides = [1, 1]} : vector<2x256xf32> to vector<2x64xf32>
    %192 = vector.extract_strided_slice %182 {offsets = [0, 128], sizes = [2, 64], strides = [1, 1]} : vector<2x256xf32> to vector<2x64xf32>
    %193 = math.tanh %192 : vector<2x64xf32>
    %194 = vector.extract_strided_slice %189 {offsets = [0, 192], sizes = [2, 64], strides = [1, 1]} : vector<2x256xf32> to vector<2x64xf32>
    %195 = arith.mulf %191, %148 : vector<2x64xf32>
    %196 = arith.mulf %190, %193 : vector<2x64xf32>
    %197 = arith.addf %195, %196 : vector<2x64xf32>
    %198 = math.tanh %197 : vector<2x64xf32>
    %199 = arith.mulf %194, %198 : vector<2x64xf32>
    %200 = vector.broadcast %2 : vector<1x64xf32> to vector<2x64xf32>
    %201 = arith.mulf %199, %200 : vector<2x64xf32>
    %cst_51 = arith.constant dense<0.000000e+00> : vector<2xf32>
    %202 = vector.multi_reduction <add>, %201, %cst_51 [1] : vector<2x64xf32> to vector<2xf32>
    %203 = vector.shape_cast %202 : vector<2xf32> to vector<2x1xf32>
    %204 = vector.broadcast %3 : vector<1x1xf32> to vector<2x1xf32>
    %205 = arith.addf %203, %204 : vector<2x1xf32>
    %c0_52 = arith.constant 0 : index
    %c3 = arith.constant 3 : index
    %206 = vector.load %arg8[%c0_52, %c3] : memref<2x8xf32, #tpu.memory_space<vmem>>, vector<2x1xf32>
    tpu.vector_store %arg8[%c0_52, %c3], %205 {strides = array<i32>} : memref<2x8xf32, #tpu.memory_space<vmem>>, vector<2x1xf32>,
    %207 = vector.extract_strided_slice %9 {offsets = [8, 0], sizes = [2, 128], strides = [1, 1]} : vector<16x128xf32> to vector<2x128xf32>
    %208 = vector.extract_strided_slice %179 {offsets = [0, 0], sizes = [2, 128], strides = [1, 1]} : vector<2x384xf32> to vector<2x128xf32>
    %209 = arith.addf %207, %208 : vector<2x128xf32>
    %cst_53 = arith.constant 5.000000e-01 : f32
    %210 = vector.broadcast %cst_53 : f32 to vector<2x128xf32>
    %211 = arith.mulf %210, %209 : vector<2x128xf32>
    %212 = math.tanh %211 : vector<2x128xf32>
    %cst_54 = arith.constant 1.000000e+00 : f32
    %213 = vector.broadcast %cst_54 : f32 to vector<2x128xf32>
    %214 = arith.addf %212, %213 : vector<2x128xf32>
    %cst_55 = arith.constant 5.000000e-01 : f32
    %215 = vector.broadcast %cst_55 : f32 to vector<2x128xf32>
    %216 = arith.mulf %215, %214 : vector<2x128xf32>
    %217 = vector.extract_strided_slice %216 {offsets = [0, 0], sizes = [2, 32], strides = [1, 1]} : vector<2x128xf32> to vector<2x32xf32>
    %218 = vector.extract_strided_slice %216 {offsets = [0, 32], sizes = [2, 32], strides = [1, 1]} : vector<2x128xf32> to vector<2x32xf32>
    %219 = vector.extract_strided_slice %209 {offsets = [0, 64], sizes = [2, 32], strides = [1, 1]} : vector<2x128xf32> to vector<2x32xf32>
    %220 = math.tanh %219 : vector<2x32xf32>
    %221 = vector.extract_strided_slice %216 {offsets = [0, 96], sizes = [2, 32], strides = [1, 1]} : vector<2x128xf32> to vector<2x32xf32>
    %222 = arith.mulf %218, %175 : vector<2x32xf32>
    %223 = arith.mulf %217, %220 : vector<2x32xf32>
    %224 = arith.addf %222, %223 : vector<2x32xf32>
    %225 = math.tanh %224 : vector<2x32xf32>
    %226 = arith.mulf %221, %225 : vector<2x32xf32>
    %227 = tpu.concatenate %226, %199 in 1 : vector<2x32xf32>, vector<2x64xf32> -> vector<2x96xf32>
    %cst_56 = arith.constant dense<0.000000e+00> : vector<2x384xf32>
    %228 = tpu.matmul %227, %0, %cst_56 {dimension_numbers = #tpu.dot_dimension_numbers<[1], [0], [0], [1], [0, 0, 1, 1], [], []>} : vector<2x96xf32>, vector<96x384xf32>, vector<2x384xf32> -> vector<2x384xf32>
    %229 = vector.extract_strided_slice %228 {offsets = [0, 128], sizes = [2, 256], strides = [1, 1]} : vector<2x384xf32> to vector<2x256xf32>
    %230 = vector.broadcast %1 : vector<1x256xf32> to vector<2x256xf32>
    %231 = arith.addf %229, %230 : vector<2x256xf32>
    %cst_57 = arith.constant 5.000000e-01 : f32
    %232 = vector.broadcast %cst_57 : f32 to vector<2x256xf32>
    %233 = arith.mulf %232, %231 : vector<2x256xf32>
    %234 = math.tanh %233 : vector<2x256xf32>
    %cst_58 = arith.constant 1.000000e+00 : f32
    %235 = vector.broadcast %cst_58 : f32 to vector<2x256xf32>
    %236 = arith.addf %234, %235 : vector<2x256xf32>
    %cst_59 = arith.constant 5.000000e-01 : f32
    %237 = vector.broadcast %cst_59 : f32 to vector<2x256xf32>
    %238 = arith.mulf %237, %236 : vector<2x256xf32>
    %239 = vector.extract_strided_slice %238 {offsets = [0, 0], sizes = [2, 64], strides = [1, 1]} : vector<2x256xf32> to vector<2x64xf32>
    %240 = vector.extract_strided_slice %238 {offsets = [0, 64], sizes = [2, 64], strides = [1, 1]} : vector<2x256xf32> to vector<2x64xf32>
    %241 = vector.extract_strided_slice %231 {offsets = [0, 128], sizes = [2, 64], strides = [1, 1]} : vector<2x256xf32> to vector<2x64xf32>
    %242 = math.tanh %241 : vector<2x64xf32>
    %243 = vector.extract_strided_slice %238 {offsets = [0, 192], sizes = [2, 64], strides = [1, 1]} : vector<2x256xf32> to vector<2x64xf32>
    %244 = arith.mulf %240, %197 : vector<2x64xf32>
    %245 = arith.mulf %239, %242 : vector<2x64xf32>
    %246 = arith.addf %244, %245 : vector<2x64xf32>
    %247 = math.tanh %246 : vector<2x64xf32>
    %248 = arith.mulf %243, %247 : vector<2x64xf32>
    %249 = vector.broadcast %2 : vector<1x64xf32> to vector<2x64xf32>
    %250 = arith.mulf %248, %249 : vector<2x64xf32>
    %cst_60 = arith.constant dense<0.000000e+00> : vector<2xf32>
    %251 = vector.multi_reduction <add>, %250, %cst_60 [1] : vector<2x64xf32> to vector<2xf32>
    %252 = vector.shape_cast %251 : vector<2xf32> to vector<2x1xf32>
    %253 = vector.broadcast %3 : vector<1x1xf32> to vector<2x1xf32>
    %254 = arith.addf %252, %253 : vector<2x1xf32>
    %c0_61 = arith.constant 0 : index
    %c4 = arith.constant 4 : index
    %255 = vector.load %arg8[%c0_61, %c4] : memref<2x8xf32, #tpu.memory_space<vmem>>, vector<2x1xf32>
    tpu.vector_store %arg8[%c0_61, %c4], %254 {strides = array<i32>} : memref<2x8xf32, #tpu.memory_space<vmem>>, vector<2x1xf32>,
    %256 = vector.extract_strided_slice %9 {offsets = [10, 0], sizes = [2, 128], strides = [1, 1]} : vector<16x128xf32> to vector<2x128xf32>
    %257 = vector.extract_strided_slice %228 {offsets = [0, 0], sizes = [2, 128], strides = [1, 1]} : vector<2x384xf32> to vector<2x128xf32>
    %258 = arith.addf %256, %257 : vector<2x128xf32>
    %cst_62 = arith.constant 5.000000e-01 : f32
    %259 = vector.broadcast %cst_62 : f32 to vector<2x128xf32>
    %260 = arith.mulf %259, %258 : vector<2x128xf32>
    %261 = math.tanh %260 : vector<2x128xf32>
    %cst_63 = arith.constant 1.000000e+00 : f32
    %262 = vector.broadcast %cst_63 : f32 to vector<2x128xf32>
    %263 = arith.addf %261, %262 : vector<2x128xf32>
    %cst_64 = arith.constant 5.000000e-01 : f32
    %264 = vector.broadcast %cst_64 : f32 to vector<2x128xf32>
    %265 = arith.mulf %264, %263 : vector<2x128xf32>
    %266 = vector.extract_strided_slice %265 {offsets = [0, 0], sizes = [2, 32], strides = [1, 1]} : vector<2x128xf32> to vector<2x32xf32>
    %267 = vector.extract_strided_slice %265 {offsets = [0, 32], sizes = [2, 32], strides = [1, 1]} : vector<2x128xf32> to vector<2x32xf32>
    %268 = vector.extract_strided_slice %258 {offsets = [0, 64], sizes = [2, 32], strides = [1, 1]} : vector<2x128xf32> to vector<2x32xf32>
    %269 = math.tanh %268 : vector<2x32xf32>
    %270 = vector.extract_strided_slice %265 {offsets = [0, 96], sizes = [2, 32], strides = [1, 1]} : vector<2x128xf32> to vector<2x32xf32>
    %271 = arith.mulf %267, %224 : vector<2x32xf32>
    %272 = arith.mulf %266, %269 : vector<2x32xf32>
    %273 = arith.addf %271, %272 : vector<2x32xf32>
    %274 = math.tanh %273 : vector<2x32xf32>
    %275 = arith.mulf %270, %274 : vector<2x32xf32>
    %276 = tpu.concatenate %275, %248 in 1 : vector<2x32xf32>, vector<2x64xf32> -> vector<2x96xf32>
    %cst_65 = arith.constant dense<0.000000e+00> : vector<2x384xf32>
    %277 = tpu.matmul %276, %0, %cst_65 {dimension_numbers = #tpu.dot_dimension_numbers<[1], [0], [0], [1], [0, 0, 1, 1], [], []>} : vector<2x96xf32>, vector<96x384xf32>, vector<2x384xf32> -> vector<2x384xf32>
    %278 = vector.extract_strided_slice %277 {offsets = [0, 128], sizes = [2, 256], strides = [1, 1]} : vector<2x384xf32> to vector<2x256xf32>
    %279 = vector.broadcast %1 : vector<1x256xf32> to vector<2x256xf32>
    %280 = arith.addf %278, %279 : vector<2x256xf32>
    %cst_66 = arith.constant 5.000000e-01 : f32
    %281 = vector.broadcast %cst_66 : f32 to vector<2x256xf32>
    %282 = arith.mulf %281, %280 : vector<2x256xf32>
    %283 = math.tanh %282 : vector<2x256xf32>
    %cst_67 = arith.constant 1.000000e+00 : f32
    %284 = vector.broadcast %cst_67 : f32 to vector<2x256xf32>
    %285 = arith.addf %283, %284 : vector<2x256xf32>
    %cst_68 = arith.constant 5.000000e-01 : f32
    %286 = vector.broadcast %cst_68 : f32 to vector<2x256xf32>
    %287 = arith.mulf %286, %285 : vector<2x256xf32>
    %288 = vector.extract_strided_slice %287 {offsets = [0, 0], sizes = [2, 64], strides = [1, 1]} : vector<2x256xf32> to vector<2x64xf32>
    %289 = vector.extract_strided_slice %287 {offsets = [0, 64], sizes = [2, 64], strides = [1, 1]} : vector<2x256xf32> to vector<2x64xf32>
    %290 = vector.extract_strided_slice %280 {offsets = [0, 128], sizes = [2, 64], strides = [1, 1]} : vector<2x256xf32> to vector<2x64xf32>
    %291 = math.tanh %290 : vector<2x64xf32>
    %292 = vector.extract_strided_slice %287 {offsets = [0, 192], sizes = [2, 64], strides = [1, 1]} : vector<2x256xf32> to vector<2x64xf32>
    %293 = arith.mulf %289, %246 : vector<2x64xf32>
    %294 = arith.mulf %288, %291 : vector<2x64xf32>
    %295 = arith.addf %293, %294 : vector<2x64xf32>
    %296 = math.tanh %295 : vector<2x64xf32>
    %297 = arith.mulf %292, %296 : vector<2x64xf32>
    %298 = vector.broadcast %2 : vector<1x64xf32> to vector<2x64xf32>
    %299 = arith.mulf %297, %298 : vector<2x64xf32>
    %cst_69 = arith.constant dense<0.000000e+00> : vector<2xf32>
    %300 = vector.multi_reduction <add>, %299, %cst_69 [1] : vector<2x64xf32> to vector<2xf32>
    %301 = vector.shape_cast %300 : vector<2xf32> to vector<2x1xf32>
    %302 = vector.broadcast %3 : vector<1x1xf32> to vector<2x1xf32>
    %303 = arith.addf %301, %302 : vector<2x1xf32>
    %c0_70 = arith.constant 0 : index
    %c5 = arith.constant 5 : index
    %304 = vector.load %arg8[%c0_70, %c5] : memref<2x8xf32, #tpu.memory_space<vmem>>, vector<2x1xf32>
    tpu.vector_store %arg8[%c0_70, %c5], %303 {strides = array<i32>} : memref<2x8xf32, #tpu.memory_space<vmem>>, vector<2x1xf32>,
    %305 = vector.extract_strided_slice %9 {offsets = [12, 0], sizes = [2, 128], strides = [1, 1]} : vector<16x128xf32> to vector<2x128xf32>
    %306 = vector.extract_strided_slice %277 {offsets = [0, 0], sizes = [2, 128], strides = [1, 1]} : vector<2x384xf32> to vector<2x128xf32>
    %307 = arith.addf %305, %306 : vector<2x128xf32>
    %cst_71 = arith.constant 5.000000e-01 : f32
    %308 = vector.broadcast %cst_71 : f32 to vector<2x128xf32>
    %309 = arith.mulf %308, %307 : vector<2x128xf32>
    %310 = math.tanh %309 : vector<2x128xf32>
    %cst_72 = arith.constant 1.000000e+00 : f32
    %311 = vector.broadcast %cst_72 : f32 to vector<2x128xf32>
    %312 = arith.addf %310, %311 : vector<2x128xf32>
    %cst_73 = arith.constant 5.000000e-01 : f32
    %313 = vector.broadcast %cst_73 : f32 to vector<2x128xf32>
    %314 = arith.mulf %313, %312 : vector<2x128xf32>
    %315 = vector.extract_strided_slice %314 {offsets = [0, 0], sizes = [2, 32], strides = [1, 1]} : vector<2x128xf32> to vector<2x32xf32>
    %316 = vector.extract_strided_slice %314 {offsets = [0, 32], sizes = [2, 32], strides = [1, 1]} : vector<2x128xf32> to vector<2x32xf32>
    %317 = vector.extract_strided_slice %307 {offsets = [0, 64], sizes = [2, 32], strides = [1, 1]} : vector<2x128xf32> to vector<2x32xf32>
    %318 = math.tanh %317 : vector<2x32xf32>
    %319 = vector.extract_strided_slice %314 {offsets = [0, 96], sizes = [2, 32], strides = [1, 1]} : vector<2x128xf32> to vector<2x32xf32>
    %320 = arith.mulf %316, %273 : vector<2x32xf32>
    %321 = arith.mulf %315, %318 : vector<2x32xf32>
    %322 = arith.addf %320, %321 : vector<2x32xf32>
    %323 = math.tanh %322 : vector<2x32xf32>
    %324 = arith.mulf %319, %323 : vector<2x32xf32>
    %325 = tpu.concatenate %324, %297 in 1 : vector<2x32xf32>, vector<2x64xf32> -> vector<2x96xf32>
    %cst_74 = arith.constant dense<0.000000e+00> : vector<2x384xf32>
    %326 = tpu.matmul %325, %0, %cst_74 {dimension_numbers = #tpu.dot_dimension_numbers<[1], [0], [0], [1], [0, 0, 1, 1], [], []>} : vector<2x96xf32>, vector<96x384xf32>, vector<2x384xf32> -> vector<2x384xf32>
    %327 = vector.extract_strided_slice %326 {offsets = [0, 128], sizes = [2, 256], strides = [1, 1]} : vector<2x384xf32> to vector<2x256xf32>
    %328 = vector.broadcast %1 : vector<1x256xf32> to vector<2x256xf32>
    %329 = arith.addf %327, %328 : vector<2x256xf32>
    %cst_75 = arith.constant 5.000000e-01 : f32
    %330 = vector.broadcast %cst_75 : f32 to vector<2x256xf32>
    %331 = arith.mulf %330, %329 : vector<2x256xf32>
    %332 = math.tanh %331 : vector<2x256xf32>
    %cst_76 = arith.constant 1.000000e+00 : f32
    %333 = vector.broadcast %cst_76 : f32 to vector<2x256xf32>
    %334 = arith.addf %332, %333 : vector<2x256xf32>
    %cst_77 = arith.constant 5.000000e-01 : f32
    %335 = vector.broadcast %cst_77 : f32 to vector<2x256xf32>
    %336 = arith.mulf %335, %334 : vector<2x256xf32>
    %337 = vector.extract_strided_slice %336 {offsets = [0, 0], sizes = [2, 64], strides = [1, 1]} : vector<2x256xf32> to vector<2x64xf32>
    %338 = vector.extract_strided_slice %336 {offsets = [0, 64], sizes = [2, 64], strides = [1, 1]} : vector<2x256xf32> to vector<2x64xf32>
    %339 = vector.extract_strided_slice %329 {offsets = [0, 128], sizes = [2, 64], strides = [1, 1]} : vector<2x256xf32> to vector<2x64xf32>
    %340 = math.tanh %339 : vector<2x64xf32>
    %341 = vector.extract_strided_slice %336 {offsets = [0, 192], sizes = [2, 64], strides = [1, 1]} : vector<2x256xf32> to vector<2x64xf32>
    %342 = arith.mulf %338, %295 : vector<2x64xf32>
    %343 = arith.mulf %337, %340 : vector<2x64xf32>
    %344 = arith.addf %342, %343 : vector<2x64xf32>
    %345 = math.tanh %344 : vector<2x64xf32>
    %346 = arith.mulf %341, %345 : vector<2x64xf32>
    %347 = vector.broadcast %2 : vector<1x64xf32> to vector<2x64xf32>
    %348 = arith.mulf %346, %347 : vector<2x64xf32>
    %cst_78 = arith.constant dense<0.000000e+00> : vector<2xf32>
    %349 = vector.multi_reduction <add>, %348, %cst_78 [1] : vector<2x64xf32> to vector<2xf32>
    %350 = vector.shape_cast %349 : vector<2xf32> to vector<2x1xf32>
    %351 = vector.broadcast %3 : vector<1x1xf32> to vector<2x1xf32>
    %352 = arith.addf %350, %351 : vector<2x1xf32>
    %c0_79 = arith.constant 0 : index
    %c6 = arith.constant 6 : index
    %353 = vector.load %arg8[%c0_79, %c6] : memref<2x8xf32, #tpu.memory_space<vmem>>, vector<2x1xf32>
    tpu.vector_store %arg8[%c0_79, %c6], %352 {strides = array<i32>} : memref<2x8xf32, #tpu.memory_space<vmem>>, vector<2x1xf32>,
    %354 = vector.extract_strided_slice %9 {offsets = [14, 0], sizes = [2, 128], strides = [1, 1]} : vector<16x128xf32> to vector<2x128xf32>
    %355 = vector.extract_strided_slice %326 {offsets = [0, 0], sizes = [2, 128], strides = [1, 1]} : vector<2x384xf32> to vector<2x128xf32>
    %356 = arith.addf %354, %355 : vector<2x128xf32>
    %cst_80 = arith.constant 5.000000e-01 : f32
    %357 = vector.broadcast %cst_80 : f32 to vector<2x128xf32>
    %358 = arith.mulf %357, %356 : vector<2x128xf32>
    %359 = math.tanh %358 : vector<2x128xf32>
    %cst_81 = arith.constant 1.000000e+00 : f32
    %360 = vector.broadcast %cst_81 : f32 to vector<2x128xf32>
    %361 = arith.addf %359, %360 : vector<2x128xf32>
    %cst_82 = arith.constant 5.000000e-01 : f32
    %362 = vector.broadcast %cst_82 : f32 to vector<2x128xf32>
    %363 = arith.mulf %362, %361 : vector<2x128xf32>
    %364 = vector.extract_strided_slice %363 {offsets = [0, 0], sizes = [2, 32], strides = [1, 1]} : vector<2x128xf32> to vector<2x32xf32>
    %365 = vector.extract_strided_slice %363 {offsets = [0, 32], sizes = [2, 32], strides = [1, 1]} : vector<2x128xf32> to vector<2x32xf32>
    %366 = vector.extract_strided_slice %356 {offsets = [0, 64], sizes = [2, 32], strides = [1, 1]} : vector<2x128xf32> to vector<2x32xf32>
    %367 = math.tanh %366 : vector<2x32xf32>
    %368 = vector.extract_strided_slice %363 {offsets = [0, 96], sizes = [2, 32], strides = [1, 1]} : vector<2x128xf32> to vector<2x32xf32>
    %369 = arith.mulf %365, %322 : vector<2x32xf32>
    %370 = arith.mulf %364, %367 : vector<2x32xf32>
    %371 = arith.addf %369, %370 : vector<2x32xf32>
    %372 = math.tanh %371 : vector<2x32xf32>
    %373 = arith.mulf %368, %372 : vector<2x32xf32>
    %374 = tpu.concatenate %373, %346 in 1 : vector<2x32xf32>, vector<2x64xf32> -> vector<2x96xf32>
    %cst_83 = arith.constant dense<0.000000e+00> : vector<2x384xf32>
    %375 = tpu.matmul %374, %0, %cst_83 {dimension_numbers = #tpu.dot_dimension_numbers<[1], [0], [0], [1], [0, 0, 1, 1], [], []>} : vector<2x96xf32>, vector<96x384xf32>, vector<2x384xf32> -> vector<2x384xf32>
    %376 = vector.extract_strided_slice %375 {offsets = [0, 128], sizes = [2, 256], strides = [1, 1]} : vector<2x384xf32> to vector<2x256xf32>
    %377 = vector.broadcast %1 : vector<1x256xf32> to vector<2x256xf32>
    %378 = arith.addf %376, %377 : vector<2x256xf32>
    %cst_84 = arith.constant 5.000000e-01 : f32
    %379 = vector.broadcast %cst_84 : f32 to vector<2x256xf32>
    %380 = arith.mulf %379, %378 : vector<2x256xf32>
    %381 = math.tanh %380 : vector<2x256xf32>
    %cst_85 = arith.constant 1.000000e+00 : f32
    %382 = vector.broadcast %cst_85 : f32 to vector<2x256xf32>
    %383 = arith.addf %381, %382 : vector<2x256xf32>
    %cst_86 = arith.constant 5.000000e-01 : f32
    %384 = vector.broadcast %cst_86 : f32 to vector<2x256xf32>
    %385 = arith.mulf %384, %383 : vector<2x256xf32>
    %386 = vector.extract_strided_slice %385 {offsets = [0, 0], sizes = [2, 64], strides = [1, 1]} : vector<2x256xf32> to vector<2x64xf32>
    %387 = vector.extract_strided_slice %385 {offsets = [0, 64], sizes = [2, 64], strides = [1, 1]} : vector<2x256xf32> to vector<2x64xf32>
    %388 = vector.extract_strided_slice %378 {offsets = [0, 128], sizes = [2, 64], strides = [1, 1]} : vector<2x256xf32> to vector<2x64xf32>
    %389 = math.tanh %388 : vector<2x64xf32>
    %390 = vector.extract_strided_slice %385 {offsets = [0, 192], sizes = [2, 64], strides = [1, 1]} : vector<2x256xf32> to vector<2x64xf32>
    %391 = arith.mulf %387, %344 : vector<2x64xf32>
    %392 = arith.mulf %386, %389 : vector<2x64xf32>
    %393 = arith.addf %391, %392 : vector<2x64xf32>
    %394 = math.tanh %393 : vector<2x64xf32>
    %395 = arith.mulf %390, %394 : vector<2x64xf32>
    %396 = vector.broadcast %2 : vector<1x64xf32> to vector<2x64xf32>
    %397 = arith.mulf %395, %396 : vector<2x64xf32>
    %cst_87 = arith.constant dense<0.000000e+00> : vector<2xf32>
    %398 = vector.multi_reduction <add>, %397, %cst_87 [1] : vector<2x64xf32> to vector<2xf32>
    %399 = vector.shape_cast %398 : vector<2xf32> to vector<2x1xf32>
    %400 = vector.broadcast %3 : vector<1x1xf32> to vector<2x1xf32>
    %401 = arith.addf %399, %400 : vector<2x1xf32>
    %c0_88 = arith.constant 0 : index
    %c7 = arith.constant 7 : index
    %402 = vector.load %arg8[%c0_88, %c7] : memref<2x8xf32, #tpu.memory_space<vmem>>, vector<2x1xf32>
    tpu.vector_store %arg8[%c0_88, %c7], %401 {strides = array<i32>} : memref<2x8xf32, #tpu.memory_space<vmem>>, vector<2x1xf32>,
    return
  }
  func.func @transform_0(%arg0: i32) -> (i32, i32) {
    %c0_i32 = arith.constant 0 : i32
    %c0_i32_0 = arith.constant 0 : i32
    %c0_i32_1 = arith.constant 0 : i32
    return %c0_i32, %c0_i32_0 : i32, i32
  }
  func.func @transform_1(%arg0: i32) -> (i32, i32) {
    %c0_i32 = arith.constant 0 : i32
    %c0_i32_0 = arith.constant 0 : i32
    %c0_i32_1 = arith.constant 0 : i32
    return %c0_i32, %c0_i32_0 : i32, i32
  }
  func.func @transform_2(%arg0: i32) -> (i32, i32) {
    %c0_i32 = arith.constant 0 : i32
    %c0_i32_0 = arith.constant 0 : i32
    %c0_i32_1 = arith.constant 0 : i32
    return %c0_i32, %c0_i32_0 : i32, i32
  }
  func.func @transform_3(%arg0: i32) -> (i32, i32) {
    %c0_i32 = arith.constant 0 : i32
    %c0_i32_0 = arith.constant 0 : i32
    %c0_i32_1 = arith.constant 0 : i32
    return %c0_i32, %c0_i32_0 : i32, i32
  }
  func.func @transform_4(%arg0: i32) -> (i32, i32) {
    %c0_i32 = arith.constant 0 : i32
    %c0_i32_0 = arith.constant 0 : i32
    %c0_i32_1 = arith.constant 0 : i32
    return %c0_i32, %c0_i32_0 : i32, i32
  }
  func.func @transform_5(%arg0: i32) -> (i32, i32) {
    %c0_i32 = arith.constant 0 : i32
    %c0_i32_0 = arith.constant 0 : i32
    %c0_i32_1 = arith.constant 0 : i32
    return %c0_i32, %c0_i32_0 : i32, i32
  }
  func.func @transform_6(%arg0: i32) -> (i32, i32) {
    %c0_i32 = arith.constant 0 : i32
    %c0_i32_0 = arith.constant 0 : i32
    %c0_i32_1 = arith.constant 0 : i32
    return %c0_i32, %c0_i32_0 : i32, i32
  }
  func.func @transform_7(%arg0: i32) -> (i32, i32) {
    %c0_i32 = arith.constant 0 : i32
    %c0_i32_0 = arith.constant 0 : i32
    %c0_i32_1 = arith.constant 0 : i32
    return %c0_i32, %c0_i32_0 : i32, i32
  }
}

</mosaic_0001>

<bundles_post_ra>
// kernel: decoder_forward.1
= control target key start
LH: loop header
LB: loop body
LE: loop exit
PB: predicated region body
PF: predicated region fallthrough
CT: control target
= control target key end

     0   :  { %s2090_s0 = inlined_call_operand.vmem [shape: f32[16,32], index: 0, kind: input, shape index: {}]   ;;  %s2091_s1 = inlined_call_operand.vmem [shape: f32[32,128], index: 1, kind: input, shape index: {}]   ;;  %s2092_s2 = inlined_call_operand.vmem [shape: f32[1,128], index: 2, kind: input, shape index: {}]   ;;  %s2093_s3 = inlined_call_operand.hbm [shape: f32[96,384], index: 3, kind: input, shape index: {}]   ;;  %s2094_s4 = inlined_call_operand.vmem [shape: f32[1,256], index: 4, kind: input, shape index: {}]   ;;  %s2095_s5 = inlined_call_operand.vmem [shape: f32[1,64], index: 5, kind: input, shape index: {}]   ;;  %s2096_s6 = inlined_call_operand.<no memory space> [shape: f32[1,1], index: 6, kind: input, shape index: {}]   ;;  %s2097_s7 = inlined_call_operand.hbm [shape: f32[2,8], index: 7, kind: output, shape index: {}]  }
   0x1   :  { %v12_v0 = vstv %s2096_s6 }
   0x2   :  { %13 = vst [vmem:[#allocation2] sm:$0x1] %v12_v0 }
   0x3   :  { %14 = vsyncpa [#allocation4], 0 }
   0x4   :  { %15 = vsyncpa [#allocation5], 0  ;;  %s26_s28 = sshll.u32 %s2093_s3, 4  ;;  %s1430_s29 = smov [#allocation3]   ;;  %s27_s28 = int_to_ptr.hbm [resolvable:$true] %s26_s28 }
   0x5   :  { %s28_s30 = sshll.u32 %s1430_s29, 4  ;;  %s1431_s8 = smov 384   ;;  %s29_s30 = int_to_ptr.vmem [resolvable:$true] %s28_s30 }
   0x6   :  { %s1432_s9 = smov 24  }
   0x7   :  { %34 = dma.hbm_to_vmem [thread:$0]  %s27_s28, 4608, %s29_s30, [#allocation4], %s1431_s8, %s1431_s8, %s1432_s9  }
   0x8   :  { %1426 = dma.done.wait [#allocation4], 4608  }
   0x9   :  { %1427 = vsyncadd [#allocation4], 4294962688  ;;  %v89_v1 = vld [vmem:[%s2091_s1 + $0x18] sm:$0xff]  ;;  %v88_v2 = vld [vmem:[%s2091_s1 + $0x10] sm:$0xff]  ;;  %vm94_vm0 = vcmask 261120   ;;  %vm151_vm1 = vcmask 785408  }
   0xa   :  { %113 = vmatpush.msra.mxu0 %v89_v1  ;;  %v87_v3 = vld [vmem:[%s2091_s1 + $0x8] sm:$0xff]  ;;  %v86_v4 = vld [vmem:[%s2091_s1] sm:$0xff]  ;;  %s1433_s1 = smov 64   ;;  %v1528_v21 = vld [vmem:[#allocation3 + $0x110] sm:$0xff]  ;;  %vm250_vm2 = vcmask 517120   ;;  %vm258_vm3 = vcmask 1024  }
   0xb   :  { %v84_v5 = vld [vmem:[%s2090_s0] sm:$0xff]  ;;  %v1526_v20 = vld [vmem:[#allocation3 + $0x108] sm:$0xff]  ;;  %179 = vmatpush.msra.mxu2 %v1528_v21  ;;  %v1534_v23 = vld [vmem:[#allocation3 + $0xf0] sm:$0xff]  ;;  %vm396_vm4 = vcmask 9224   ;;  %s1437_s25 = smov 2   ;;  %vm534_vm5 = vcmask 17424  }
   0xc   :  { %114 = vmatpush.msra.mxu0 %v88_v2  ;;  %v1509_v6 = vld [vmem:[%s2092_s2] ss:$0 sm:$0xff]  ;;  %s1434_s2 = smov 32   ;;  %159 = vmatpush.msra.mxu1 %v1526_v20  ;;  %v1538_v25 = vld [vmem:[#allocation3 + $0x100] sm:$0xff]  ;;  %v1548_v28 = vld [vmem:[#allocation3 + $0xe8] sm:$0xff]  ;;  %s1438_s26 = smov 3  }
   0xd   :  { %v1530_v22 = vld [vmem:[#allocation3 + $0x118] sm:$0xff]  ;;  %v1543_v27 = vld [vmem:[#allocation3 + $0xe0] sm:$0xff]  ;;  %v1553_v30 = vld [vmem:[#allocation3 + $0xc8] sm:$0xff]  ;;  %s1439_s27 = smov 4   ;;  %s1440_s28 = smov 6   ;;  %vm672_vm6 = vcmask 25624  }
   0xe   :  { %115 = vmatpush.msra.mxu0 %v87_v3  ;;  %v1536_v24 = vld [vmem:[#allocation3 + $0xf8] sm:$0xff]  ;;  %199 = vmatpush.msra.mxu3 %v1530_v22  ;;  %v1551_v29 = vld [vmem:[#allocation3 + $0xc0] sm:$0xff]  ;;  %v1558_v31 = vld [vmem:[#allocation3 + $0xd0] sm:$0xff]  ;;  %s1441_s29 = smov 7   ;;  %vm805_vm7 = vcmask 33824   ;;  %s1442_s30 = smov 5  }
   0xf   :  { %v1541_v26 = vld [vmem:[#allocation3 + $0xd8] sm:$0xff]  ;;  %160 = vmatpush.msra.mxu1 %v1534_v23  ;;  %180 = vmatpush.msra.mxu2 %v1536_v24  ;;  %v1561_v32 = vld [vmem:[#allocation3 + $0xa8] sm:$0xff]  ;;  %v1563_v33 = vld [vmem:[#allocation3 + $0xb0] sm:$0xff]  ;;  %vm943_vm8 = vcmask 42024   ;;  %s1443_s8 = smov [#allocation6]   ;;  %s1208_s6 = sshll.u32 %s2097_s7, 4  ;;  %s1209_s6 = int_to_ptr.hbm [resolvable:$true] %s1208_s6 }
  0x10   :  { %116 = vmatpush.msra.mxu0 %v86_v4  ;;  %200 = vmatpush.msra.mxu3 %v1538_v25  ;;  %v1568_v34 = vld [vmem:[#allocation3 + $0xb8] sm:$0xff]  ;;  %v1571_v35 = vld [vmem:[#allocation3 + $0x90] sm:$0xff]  ;;  %v1578_v37 = vld [vmem:[#allocation3 + $0xa0] sm:$0xff]  ;;  %s1206_s9 = sshll.u32 %s1443_s8, 4  ;;  %vm1081_vm9 = vcmask 50224   ;;  %vm1199_vm10 = vcmask 58424   ;;  %s1207_s9 = int_to_ptr.vmem [resolvable:$true] %s1206_s9 }
  0x11   :  { %1218 = vmatmul.msk.f32.vlgmr.msra.gmra.mxu0 %vm94_vm0, %v84_v5  ;;  %161 = vmatpush.msra.mxu1 %v1541_v26  ;;  %v1573_v36 = vld [vmem:[#allocation3 + $0x98] sm:$0xff]  ;;  %v1583_v39 = vld [vmem:[#allocation3 + $0x80] sm:$0xff]  ;;  %v1588_v40 = vld [vmem:[#allocation3 + $0x88] sm:$0xff] }
  0x12   :  { %307 = vmatpush.msrb.mxu0 %v1526_v20  ;;  %181 = vmatpush.msra.mxu2 %v1543_v27  ;;  %v1581_v38 = vld [vmem:[#allocation3 + $0x78] sm:$0xff]  ;;  %v1591_v41 = vld [vmem:[#allocation3 + $0x60] sm:$0xff]  ;;  %v1593_v42 = vld [vmem:[#allocation3 + $0x68] sm:$0xff] }
  0x13   :  { %201 = vmatpush.msra.mxu3 %v1548_v28  ;;  %162 = vmatpush.msra.mxu1 %v1551_v29  ;;  %v1598_v43 = vld [vmem:[#allocation3 + $0x70] sm:$0xff]  ;;  %v1601_v44 = vld [vmem:[#allocation3 + $0x48] sm:$0xff]  ;;  %v1608_v46 = vld [vmem:[#allocation3 + $0x58] sm:$0xff] }
  0x14   :  { %308 = vmatpush.msrb.mxu0 %v1534_v23  ;;  %182 = vmatpush.msra.mxu2 %v1553_v30  ;;  %v1603_v45 = vld [vmem:[#allocation3 + $0x50] sm:$0xff]  ;;  %v1613_v48 = vld [vmem:[#allocation3 + $0x38] sm:$0xff]  ;;  %v1618_v49 = vld [vmem:[#allocation3 + $0x40] sm:$0xff] }
  0x15   :  { %202 = vmatpush.msra.mxu3 %v1558_v31  ;;  %163 = vmatpush.msra.mxu1 %v1561_v32  ;;  %v1611_v47 = vld [vmem:[#allocation3 + $0x30] sm:$0xff]  ;;  %v1621_v50 = vld [vmem:[#allocation3 + $0x18] sm:$0xff]  ;;  %v1623_v51 = vld [vmem:[#allocation3 + $0x20] sm:$0xff] }
  0x16   :  { %309 = vmatpush.msrb.mxu0 %v1541_v26  ;;  %183 = vmatpush.msra.mxu2 %v1563_v33  ;;  %v1628_v52 = vld [vmem:[#allocation3 + $0x28] sm:$0xff]  ;;  %v1638_v55 = vld [vmem:[#allocation3] sm:$0xff]  ;;  %v1642_v57 = vld [vmem:[#allocation3 + $0x10] sm:$0xff] }
  0x17   :  { %203 = vmatpush.msra.mxu3 %v1568_v34  ;;  %164 = vmatpush.msra.mxu1 %v1571_v35  ;;  %v1640_v56 = vld [vmem:[#allocation3 + $0x8] sm:$0xff]  ;;  %v81_v61 = vld [vmem:[%s2094_s4] sm:$0x3]  ;;  %s1435_s4 = smov 96  }
  0x18   :  { %310 = vmatpush.msrb.mxu0 %v1551_v29  ;;  %184 = vmatpush.msra.mxu2 %v1573_v36  ;;  %v1740_v0 = vperm.slane %v81_v61, 0  ;;  %v1743_v3 = vperm.slane %v81_v61, 1 }
  0x19   :  { %204 = vmatpush.msra.mxu3 %v1578_v37  ;;  %165 = vmatpush.msra.mxu1 %v1581_v38 }
  0x1a   :  { %311 = vmatpush.msrb.mxu0 %v1561_v32  ;;  %185 = vmatpush.msra.mxu2 %v1583_v39 }
  0x1b   :  { %205 = vmatpush.msra.mxu3 %v1588_v40  ;;  %166 = vmatpush.msra.mxu1 %v1591_v41 }
  0x1c   :  { %312 = vmatpush.msrb.mxu0 %v1571_v35  ;;  %186 = vmatpush.msra.mxu2 %v1593_v42 }
  0x1d   :  { %206 = vmatpush.msra.mxu3 %v1598_v43  ;;  %167 = vmatpush.msra.mxu1 %v1601_v44 }
  0x1e   :  { %313 = vmatpush.msrb.mxu0 %v1581_v38  ;;  %187 = vmatpush.msra.mxu2 %v1603_v45 }
  0x1f   :  { %207 = vmatpush.msra.mxu3 %v1608_v46  ;;  %168 = vmatpush.msra.mxu1 %v1611_v47 }
  0x20   :  { %314 = vmatpush.msrb.mxu0 %v1591_v41  ;;  %188 = vmatpush.msra.mxu2 %v1613_v48 }
  0x21   :  { %208 = vmatpush.msra.mxu3 %v1618_v49  ;;  %169 = vmatpush.msra.mxu1 %v1621_v50 }
  0x22   :  { %315 = vmatpush.msrb.mxu0 %v1601_v44  ;;  %189 = vmatpush.msra.mxu2 %v1623_v51 }
  0x23   :  { %209 = vmatpush.msra.mxu3 %v1628_v52  ;;  %170 = vmatpush.msra.mxu1 %v1638_v55 }
  0x24   :  { %316 = vmatpush.msrb.mxu0 %v1611_v47  ;;  %190 = vmatpush.msra.mxu2 %v1640_v56 }
  0x25   :  { %210 = vmatpush.msra.mxu3 %v1642_v57  ;;  %327 = vmatpush.msrb.mxu1 %v1528_v21 }
  0x26   :  { %317 = vmatpush.msrb.mxu0 %v1621_v50  ;;  %347 = vmatpush.msrb.mxu2 %v1530_v22 }
  0x27   :  { %328 = vmatpush.msrb.mxu1 %v1536_v24  ;;  %445 = vmatpush.msrb.mxu3 %v1526_v20 }
  0x28   :  { %318 = vmatpush.msrb.mxu0 %v1638_v55  ;;  %348 = vmatpush.msrb.mxu2 %v1538_v25 }
  0x29   :  { %329 = vmatpush.msrb.mxu1 %v1543_v27  ;;  %446 = vmatpush.msrb.mxu3 %v1534_v23 }
  0x2a   :  { %465 = vmatpush.msra.mxu0 %v1528_v21  ;;  %349 = vmatpush.msrb.mxu2 %v1548_v28 }
  0x2b   :  { %330 = vmatpush.msrb.mxu1 %v1553_v30  ;;  %447 = vmatpush.msrb.mxu3 %v1541_v26 }
  0x2c   :  { %466 = vmatpush.msra.mxu0 %v1536_v24  ;;  %350 = vmatpush.msrb.mxu2 %v1558_v31 }
  0x2d   :  { %331 = vmatpush.msrb.mxu1 %v1563_v33  ;;  %448 = vmatpush.msrb.mxu3 %v1551_v29 }
  0x2e   :  { %467 = vmatpush.msra.mxu0 %v1543_v27  ;;  %351 = vmatpush.msrb.mxu2 %v1568_v34 }
  0x2f   :  { %332 = vmatpush.msrb.mxu1 %v1573_v36  ;;  %449 = vmatpush.msrb.mxu3 %v1561_v32 }
  0x30   :  { %468 = vmatpush.msra.mxu0 %v1553_v30  ;;  %352 = vmatpush.msrb.mxu2 %v1578_v37 }
  0x31   :  { %333 = vmatpush.msrb.mxu1 %v1583_v39  ;;  %450 = vmatpush.msrb.mxu3 %v1571_v35 }
  0x32   :  { %469 = vmatpush.msra.mxu0 %v1563_v33  ;;  %353 = vmatpush.msrb.mxu2 %v1588_v40 }
  0x33   :  { %334 = vmatpush.msrb.mxu1 %v1593_v42  ;;  %451 = vmatpush.msrb.mxu3 %v1581_v38 }
  0x34   :  { %470 = vmatpush.msra.mxu0 %v1573_v36  ;;  %354 = vmatpush.msrb.mxu2 %v1598_v43 }
  0x35   :  { %335 = vmatpush.msrb.mxu1 %v1603_v45  ;;  %452 = vmatpush.msrb.mxu3 %v1591_v41 }
  0x36   :  { %471 = vmatpush.msra.mxu0 %v1583_v39  ;;  %355 = vmatpush.msrb.mxu2 %v1608_v46 }
  0x37   :  { %336 = vmatpush.msrb.mxu1 %v1613_v48  ;;  %453 = vmatpush.msrb.mxu3 %v1601_v44 }
  0x38   :  { %472 = vmatpush.msra.mxu0 %v1593_v42  ;;  %356 = vmatpush.msrb.mxu2 %v1618_v49 }
  0x39   :  { %337 = vmatpush.msrb.mxu1 %v1623_v51  ;;  %454 = vmatpush.msrb.mxu3 %v1611_v47 }
  0x3a   :  { %473 = vmatpush.msra.mxu0 %v1603_v45  ;;  %357 = vmatpush.msrb.mxu2 %v1628_v52 }
  0x3b   :  { %338 = vmatpush.msrb.mxu1 %v1640_v56  ;;  %455 = vmatpush.msrb.mxu3 %v1621_v50 }
  0x3c   :  { %474 = vmatpush.msra.mxu0 %v1613_v48  ;;  %358 = vmatpush.msrb.mxu2 %v1642_v57 }
  0x3d   :  { %456 = vmatpush.msrb.mxu3 %v1638_v55 }
  0x3e   :  { %475 = vmatpush.msra.mxu0 %v1623_v51 }
  0x40   :  { %476 = vmatpush.msra.mxu0 %v1640_v56 }
  0x8e   :  { %v118_v7 = vpop.f32.mrf.mxu0 }
  0x8f   :  { %v1512_v8 = vadd.f32 %v1509_v6, %v118_v7 }
  0x91   :  { %1260 = vtanh.f32 %v1512_v8  ;;  %v124_v10 = vmul.f32 0.5, %v1512_v8 }
  0x93   :  { %1262 = vtanh.f32 %v124_v10 }
  0x97   :  { %v1261_v9 = vpop.eup %1260 }
  0x98   :  { %131 = vrot.lane.b32.xlu0 %v1261_v9, %s1433_s1 }
  0x99   :  { %v1263_v11 = vpop.eup %1262 }
  0x9a   :  { %v126_v12 = vadd.f32 1.0, %v1263_v11 }
  0x9c   :  { %v1517_v13 = vmul.f32 0.5, %v126_v12 }
  0x9e   :  { %v129_v16 = vmul.f32 0.0, %v1517_v13 }
 0x10a   :  { %v132_v14 = vpop.permute.xlu0 %131 }
 0x10b   :  { %v134_v15 = vmul.f32 %v132_v14, %v1517_v13 }
 0x10d   :  { %136 = vrot.lane.b32.xlu0 %v134_v15, %s1434_s2 }
 0x17f   :  { %v137_v17 = vpop.permute.xlu0 %136 }
 0x180   :  { %v1522_v18 = vadd.f32 %v137_v17, %v129_v16 }
 0x182   :  { %1264 = vtanh.f32 %v1522_v18 }
 0x188   :  { %v1265_v19 = vpop.eup %1264 }
 0x189   :  { %142 = vrot.lane.b32.xlu1 %v1265_v19, %s1433_s1 }
 0x1fb   :  { %v143_v53 = vpop.permute.xlu1 %142 }
 0x1fc   :  { %v145_v54 = vmul.f32 %v143_v53, %v1517_v13 }
 0x1fe   :  { %147 = vrot.lane.b32.xlu1 %v145_v54, %s1434_s2 }
 0x270   :  { %v148_v58 = vpop.permute.xlu1 %147 }
 0x271   :  { %v150_v59 = vsel %vm94_vm0, %v148_v58, 0.0 }
 0x272   :  { %1220 = vmatmul.msk.f32.vlgmr.msra.gmra.mxu1 %vm151_vm1, %v150_v59  ;;  %1221 = vmatmul.msk.f32.vlgmr.msra.gmra.mxu2 %vm151_vm1, %v150_v59 }
 0x273   :  { %1222 = vmatmul.msk.f32.vlgmr.msra.gmra.mxu3 %vm151_vm1, %v150_v59  ;;  %485 = vmatpush.msra.mxu1 %v1530_v22 }
 0x274   :  { %583 = vmatpush.msra.mxu2 %v1526_v20  ;;  %603 = vmatpush.msra.mxu3 %v1528_v21 }
 0x275   :  { %486 = vmatpush.msra.mxu1 %v1538_v25 }
 0x276   :  { %584 = vmatpush.msra.mxu2 %v1534_v23  ;;  %604 = vmatpush.msra.mxu3 %v1536_v24 }
 0x277   :  { %487 = vmatpush.msra.mxu1 %v1548_v28 }
 0x278   :  { %585 = vmatpush.msra.mxu2 %v1541_v26  ;;  %605 = vmatpush.msra.mxu3 %v1543_v27 }
 0x279   :  { %488 = vmatpush.msra.mxu1 %v1558_v31 }
 0x27a   :  { %586 = vmatpush.msra.mxu2 %v1551_v29  ;;  %606 = vmatpush.msra.mxu3 %v1553_v30 }
 0x27b   :  { %489 = vmatpush.msra.mxu1 %v1568_v34 }
 0x27c   :  { %587 = vmatpush.msra.mxu2 %v1561_v32  ;;  %607 = vmatpush.msra.mxu3 %v1563_v33 }
 0x27d   :  { %490 = vmatpush.msra.mxu1 %v1578_v37 }
 0x27e   :  { %588 = vmatpush.msra.mxu2 %v1571_v35  ;;  %608 = vmatpush.msra.mxu3 %v1573_v36 }
 0x27f   :  { %491 = vmatpush.msra.mxu1 %v1588_v40 }
 0x280   :  { %589 = vmatpush.msra.mxu2 %v1581_v38  ;;  %609 = vmatpush.msra.mxu3 %v1583_v39 }
 0x281   :  { %492 = vmatpush.msra.mxu1 %v1598_v43 }
 0x282   :  { %590 = vmatpush.msra.mxu2 %v1591_v41  ;;  %610 = vmatpush.msra.mxu3 %v1593_v42 }
 0x283   :  { %493 = vmatpush.msra.mxu1 %v1608_v46 }
 0x284   :  { %591 = vmatpush.msra.mxu2 %v1601_v44  ;;  %611 = vmatpush.msra.mxu3 %v1603_v45 }
 0x285   :  { %494 = vmatpush.msra.mxu1 %v1618_v49 }
 0x286   :  { %592 = vmatpush.msra.mxu2 %v1611_v47  ;;  %612 = vmatpush.msra.mxu3 %v1613_v48 }
 0x287   :  { %495 = vmatpush.msra.mxu1 %v1628_v52 }
 0x288   :  { %593 = vmatpush.msra.mxu2 %v1621_v50  ;;  %613 = vmatpush.msra.mxu3 %v1623_v51 }
 0x289   :  { %496 = vmatpush.msra.mxu1 %v1642_v57 }
 0x28a   :  { %594 = vmatpush.msra.mxu2 %v1638_v55  ;;  %614 = vmatpush.msra.mxu3 %v1640_v56 }
 0x2ef   :  { %v172_v60 = vpop.f32.mrf.mxu1 }
 0x2f0   :  { %v261_v62 = vrot.slane %v172_v60, 6 }
 0x2f2   :  { %v263_v63 = vadd.f32 %v261_v62, %v1512_v8 }
 0x2f4   :  { %1266 = vtanh.f32 %v263_v63  ;;  %v264_v15 = vmul.f32 0.5, %v263_v63 }
 0x2f5   :  { %v192_v1 = vpop.f32.mrf.mxu2 }
 0x2f6   :  { %v220_v2 = vadd.f32 %v1740_v0, %v192_v1  ;;  %v212_v4 = vpop.f32.mrf.mxu3 }
 0x2f7   :  { %v221_v9 = vadd.f32 %v1743_v3, %v212_v4 }
 0x2f8   :  { %v222_v5 = vmul.f32 0.5, %v220_v2 }
 0x2f9   :  { %v223_v58 = vmul.f32 0.5, %v221_v9 }
 0x2fa   :  { %v1267_v7 = vpop.eup %1266  ;;  %1268 = vtanh.f32 %v222_v5 }
 0x2fb   :  { %274 = vrot.lane.b32.xlu2 %v1267_v7, %s1433_s1  ;;  %1270 = vtanh.f32 %v221_v9  ;;  %v270_v7 = vrot.slane %v1522_v18, 6 }
 0x2fc   :  { %1272 = vtanh.f32 %v264_v15 }
 0x2fd   :  { %1274 = vtanh.f32 %v223_v58 }
 0x300   :  { %v1269_v10 = vpop.eup %1268 }
 0x301   :  { %v226_v11 = vadd.f32 1.0, %v1269_v10  ;;  %v1271_v13 = vpop.eup %1270 }
 0x302   :  { %v1273_v16 = vpop.eup %1272 }
 0x303   :  { %v228_v12 = vmul.f32 0.5, %v226_v11  ;;  %v266_v17 = vadd.f32 1.0, %v1273_v16  ;;  %v1275_v61 = vpop.eup %1274 }
 0x304   :  { %v227_v1 = vadd.f32 1.0, %v1275_v61 }
 0x305   :  { %v232_v14 = vmul.f32 %v1271_v13, %v228_v12  ;;  %v267_v19 = vmul.f32 0.5, %v266_v17  ;;  %v231_v59 = vmul.f32 0.0, %v228_v12  ;;  %v85_v13 = vld [vmem:[%s2090_s0 + $0x8] sm:$0xff] }
 0x306   :  { %v229_v2 = vmul.f32 0.5, %v227_v1  ;;  %1219 = vmatmul.msk.f32.gmra.mxu0 %vm94_vm0, %v85_v13 }
 0x307   :  { %234 = vrot.lane.b32.xlu0 %v232_v14, %s1433_s1  ;;  %v272_v9 = vmul.f32 %v270_v7, %v267_v19 }
 0x355   :  { %v275_v53 = vpop.permute.xlu2 %274 }
 0x356   :  { %v277_v54 = vmul.f32 %v275_v53, %v267_v19 }
 0x358   :  { %279 = vrot.lane.b32.xlu2 %v277_v54, %s1434_s2 }
 0x379   :  { %v235_v60 = vpop.permute.xlu0 %234 }
 0x37a   :  { %v1749_v62 = vadd.f32 %v235_v60, %v231_v59 }
 0x37c   :  { %1276 = vtanh.f32 %v1749_v62 }
 0x382   :  { %v1277_v63 = vpop.eup %1276 }
 0x383   :  { %v1752_v4 = vmul.f32 %v1277_v63, %v229_v2 }
 0x385   :  { %v294_v5 = vrot.slane %v1752_v4, 6 }
 0x387   :  { %295 = vrot.lane.b32.xlu0 %v294_v5, %s1435_s4 }
 0x3b2   :  { %v280_v10 = vpop.permute.xlu2 %279 }
 0x3b3   :  { %v1757_v11 = vadd.f32 %v280_v10, %v272_v9 }
 0x3b5   :  { %1278 = vtanh.f32 %v1757_v11 }
 0x3bb   :  { %v1279_v12 = vpop.eup %1278 }
 0x3bc   :  { %285 = vrot.lane.b32.xlu1 %v1279_v12, %s1433_s1 }
 0x3f9   :  { %v296_v18 = vpop.permute.xlu0 %295 }
 0x42e   :  { %v286_v14 = vpop.permute.xlu1 %285 }
 0x42f   :  { %v288_v15 = vmul.f32 %v286_v14, %v267_v19  ;;  %v1806_v19 = vpop.f32.mrf.mxu0 }
 0x431   :  { %290 = vrot.lane.b32.xlu2 %v288_v15, %s1434_s2 }
 0x48b   :  { %v291_v16 = vpop.permute.xlu2 %290 }
 0x48c   :  { %v298_v17 = vsel %vm94_vm0, %v291_v16, %v296_v18 }
 0x48d   :  { %v300_v53 = vrot.slane %v298_v17, 2 }
 0x48f   :  { %1223 = vmatmul.msk.f32.vlgmr.msrb.gmra.mxu0 %vm151_vm1, %v300_v53  ;;  %1224 = vmatmul.msk.f32.vlgmr.msrb.gmra.mxu1 %vm151_vm1, %v300_v53 }
 0x490   :  { %1225 = vmatmul.msk.f32.vlgmr.msrb.gmra.mxu2 %vm151_vm1, %v300_v53  ;;  %623 = vmatpush.msrb.mxu0 %v1530_v22 }
 0x491   :  { %716 = vmatpush.msrb.mxu1 %v1526_v20  ;;  %736 = vmatpush.msrb.mxu2 %v1528_v21 }
 0x492   :  { %624 = vmatpush.msrb.mxu0 %v1538_v25 }
 0x493   :  { %717 = vmatpush.msrb.mxu1 %v1534_v23  ;;  %737 = vmatpush.msrb.mxu2 %v1536_v24 }
 0x494   :  { %625 = vmatpush.msrb.mxu0 %v1548_v28 }
 0x495   :  { %718 = vmatpush.msrb.mxu1 %v1541_v26  ;;  %738 = vmatpush.msrb.mxu2 %v1543_v27 }
 0x496   :  { %626 = vmatpush.msrb.mxu0 %v1558_v31 }
 0x497   :  { %719 = vmatpush.msrb.mxu1 %v1551_v29  ;;  %739 = vmatpush.msrb.mxu2 %v1553_v30 }
 0x498   :  { %627 = vmatpush.msrb.mxu0 %v1568_v34 }
 0x499   :  { %720 = vmatpush.msrb.mxu1 %v1561_v32  ;;  %740 = vmatpush.msrb.mxu2 %v1563_v33 }
 0x49a   :  { %628 = vmatpush.msrb.mxu0 %v1578_v37 }
 0x49b   :  { %721 = vmatpush.msrb.mxu1 %v1571_v35  ;;  %741 = vmatpush.msrb.mxu2 %v1573_v36 }
 0x49c   :  { %629 = vmatpush.msrb.mxu0 %v1588_v40 }
 0x49d   :  { %722 = vmatpush.msrb.mxu1 %v1581_v38  ;;  %742 = vmatpush.msrb.mxu2 %v1583_v39 }
 0x49e   :  { %630 = vmatpush.msrb.mxu0 %v1598_v43 }
 0x49f   :  { %723 = vmatpush.msrb.mxu1 %v1591_v41  ;;  %743 = vmatpush.msrb.mxu2 %v1593_v42 }
 0x4a0   :  { %631 = vmatpush.msrb.mxu0 %v1608_v46 }
 0x4a1   :  { %724 = vmatpush.msrb.mxu1 %v1601_v44  ;;  %744 = vmatpush.msrb.mxu2 %v1603_v45 }
 0x4a2   :  { %632 = vmatpush.msrb.mxu0 %v1618_v49 }
 0x4a3   :  { %725 = vmatpush.msrb.mxu1 %v1611_v47  ;;  %745 = vmatpush.msrb.mxu2 %v1613_v48 }
 0x4a4   :  { %633 = vmatpush.msrb.mxu0 %v1628_v52 }
 0x4a5   :  { %726 = vmatpush.msrb.mxu1 %v1621_v50  ;;  %746 = vmatpush.msrb.mxu2 %v1623_v51 }
 0x4a6   :  { %634 = vmatpush.msrb.mxu0 %v1642_v57 }
 0x4a7   :  { %727 = vmatpush.msrb.mxu1 %v1638_v55  ;;  %747 = vmatpush.msrb.mxu2 %v1640_v56 }
 0x50c   :  { %v320_v54 = vpop.f32.mrf.mxu0  ;;  %v340_v58 = vpop.f32.mrf.mxu1 }
 0x50d   :  { %v399_v59 = vrot.slane %v320_v54, 4  ;;  %v363_v60 = vadd.f32 %v340_v58, %v1740_v0 }
 0x50f   :  { %v401_v61 = vadd.f32 %v399_v59, %v1512_v8  ;;  %v365_v1 = vmul.f32 0.5, %v363_v60 }
 0x511   :  { %1280 = vtanh.f32 %v401_v61  ;;  %v402_v14 = vmul.f32 0.5, %v401_v61 }
 0x512   :  { %1282 = vtanh.f32 %v365_v1 }
 0x513   :  { %v360_v2 = vpop.f32.mrf.mxu2 }
 0x514   :  { %v364_v63 = vadd.f32 %v360_v2, %v1743_v3 }
 0x516   :  { %1284 = vtanh.f32 %v364_v63  ;;  %v366_v16 = vmul.f32 0.5, %v364_v63 }
 0x517   :  { %v1281_v5 = vpop.eup %1280  ;;  %1286 = vtanh.f32 %v402_v14 }
 0x518   :  { %v1283_v7 = vpop.eup %1282  ;;  %412 = vrot.lane.b32.xlu1 %v1281_v5, %s1433_s1  ;;  %1288 = vtanh.f32 %v366_v16 }
 0x519   :  { %v369_v9 = vadd.f32 1.0, %v1283_v7 }
 0x51b   :  { %v371_v10 = vmul.f32 0.5, %v369_v9  ;;  %v408_v9 = vrot.slane %v1757_v11, 6 }
 0x51c   :  { %v1285_v12 = vpop.eup %1284 }
 0x51d   :  { %v375_v13 = vmul.f32 %v1285_v12, %v371_v10  ;;  %v1287_v15 = vpop.eup %1286  ;;  %v374_v58 = vmul.f32 %v371_v10, %v1749_v62 }
 0x51e   :  { %v404_v18 = vadd.f32 1.0, %v1287_v15  ;;  %v1289_v60 = vpop.eup %1288 }
 0x51f   :  { %377 = vrot.lane.b32.xlu0 %v375_v13, %s1433_s1  ;;  %v370_v2 = vadd.f32 1.0, %v1289_v60 }
 0x520   :  { %v405_v17 = vmul.f32 0.5, %v404_v18 }
 0x521   :  { %v372_v61 = vmul.f32 0.5, %v370_v2 }
 0x522   :  { %v410_v12 = vmul.f32 %v408_v9, %v405_v17 }
 0x58a   :  { %v413_v53 = vpop.permute.xlu1 %412 }
 0x58b   :  { %v415_v54 = vmul.f32 %v413_v53, %v405_v17 }
 0x58d   :  { %417 = vrot.lane.b32.xlu2 %v415_v54, %s1434_s2 }
 0x591   :  { %v378_v59 = vpop.permute.xlu0 %377 }
 0x592   :  { %v1815_v1 = vadd.f32 %v378_v59, %v374_v58 }
 0x594   :  { %1290 = vtanh.f32 %v1815_v1 }
 0x59a   :  { %v1291_v5 = vpop.eup %1290 }
 0x59b   :  { %v1818_v7 = vmul.f32 %v1291_v5, %v372_v61 }
 0x59d   :  { %v432_v63 = vrot.slane %v1818_v7, 4 }
 0x59f   :  { %433 = vrot.lane.b32.xlu0 %v432_v63, %s1435_s4 }
 0x5e7   :  { %v418_v13 = vpop.permute.xlu2 %417 }
 0x5e8   :  { %v1823_v62 = vadd.f32 %v418_v13, %v410_v12 }
 0x5ea   :  { %1292 = vtanh.f32 %v1823_v62 }
 0x5f0   :  { %v1293_v10 = vpop.eup %1292 }
 0x5f1   :  { %423 = vrot.lane.b32.xlu1 %v1293_v10, %s1433_s1 }
 0x611   :  { %v434_v18 = vpop.permute.xlu0 %433 }
 0x663   :  { %v424_v14 = vpop.permute.xlu1 %423 }
 0x664   :  { %v426_v15 = vmul.f32 %v424_v14, %v405_v17 }
 0x666   :  { %428 = vrot.lane.b32.xlu2 %v426_v15, %s1434_s2 }
 0x6c0   :  { %v429_v16 = vpop.permute.xlu2 %428 }
 0x6c1   :  { %v436_v53 = vsel %vm94_vm0, %v429_v16, %v434_v18 }
 0x6c2   :  { %v438_v54 = vrot.slane %v436_v53, 4 }
 0x6c4   :  { %1226 = vmatmul.msk.f32.vlgmr.msrb.gmra.mxu3 %vm151_vm1, %v438_v54  ;;  %1227 = vmatmul.msk.f32.vlgmr.msra.gmra.mxu0 %vm151_vm1, %v438_v54 }
 0x6c5   :  { %1228 = vmatmul.msk.f32.vlgmr.msra.gmra.mxu1 %vm151_vm1, %v438_v54  ;;  %756 = vmatpush.msrb.mxu3 %v1530_v22 }
 0x6c6   :  { %854 = vmatpush.msra.mxu0 %v1526_v20  ;;  %874 = vmatpush.msra.mxu1 %v1528_v21 }
 0x6c7   :  { %757 = vmatpush.msrb.mxu3 %v1538_v25 }
 0x6c8   :  { %855 = vmatpush.msra.mxu0 %v1534_v23  ;;  %875 = vmatpush.msra.mxu1 %v1536_v24 }
 0x6c9   :  { %758 = vmatpush.msrb.mxu3 %v1548_v28 }
 0x6ca   :  { %856 = vmatpush.msra.mxu0 %v1541_v26  ;;  %876 = vmatpush.msra.mxu1 %v1543_v27 }
 0x6cb   :  { %759 = vmatpush.msrb.mxu3 %v1558_v31 }
 0x6cc   :  { %857 = vmatpush.msra.mxu0 %v1551_v29  ;;  %877 = vmatpush.msra.mxu1 %v1553_v30 }
 0x6cd   :  { %760 = vmatpush.msrb.mxu3 %v1568_v34 }
 0x6ce   :  { %858 = vmatpush.msra.mxu0 %v1561_v32  ;;  %878 = vmatpush.msra.mxu1 %v1563_v33 }
 0x6cf   :  { %761 = vmatpush.msrb.mxu3 %v1578_v37 }
 0x6d0   :  { %859 = vmatpush.msra.mxu0 %v1571_v35  ;;  %879 = vmatpush.msra.mxu1 %v1573_v36 }
 0x6d1   :  { %762 = vmatpush.msrb.mxu3 %v1588_v40 }
 0x6d2   :  { %860 = vmatpush.msra.mxu0 %v1581_v38  ;;  %880 = vmatpush.msra.mxu1 %v1583_v39 }
 0x6d3   :  { %763 = vmatpush.msrb.mxu3 %v1598_v43 }
 0x6d4   :  { %861 = vmatpush.msra.mxu0 %v1591_v41  ;;  %881 = vmatpush.msra.mxu1 %v1593_v42 }
 0x6d5   :  { %764 = vmatpush.msrb.mxu3 %v1608_v46 }
 0x6d6   :  { %862 = vmatpush.msra.mxu0 %v1601_v44  ;;  %882 = vmatpush.msra.mxu1 %v1603_v45 }
 0x6d7   :  { %765 = vmatpush.msrb.mxu3 %v1618_v49 }
 0x6d8   :  { %863 = vmatpush.msra.mxu0 %v1611_v47  ;;  %883 = vmatpush.msra.mxu1 %v1613_v48 }
 0x6d9   :  { %766 = vmatpush.msrb.mxu3 %v1628_v52 }
 0x6da   :  { %864 = vmatpush.msra.mxu0 %v1621_v50  ;;  %884 = vmatpush.msra.mxu1 %v1623_v51 }
 0x6db   :  { %767 = vmatpush.msrb.mxu3 %v1642_v57 }
 0x6dc   :  { %865 = vmatpush.msra.mxu0 %v1638_v55  ;;  %885 = vmatpush.msra.mxu1 %v1640_v56 }
 0x741   :  { %v478_v11 = vpop.f32.mrf.mxu0 }
 0x742   :  { %v501_v17 = vadd.f32 %v478_v11, %v1740_v0  ;;  %v498_v58 = vpop.f32.mrf.mxu1 }
 0x743   :  { %v502_v60 = vadd.f32 %v498_v58, %v1743_v3 }
 0x744   :  { %v503_v59 = vmul.f32 0.5, %v501_v17 }
 0x745   :  { %v504_v18 = vmul.f32 0.5, %v502_v60 }
 0x746   :  { %1294 = vtanh.f32 %v503_v59 }
 0x747   :  { %v458_v2 = vpop.f32.mrf.mxu3  ;;  %1296 = vtanh.f32 %v502_v60 }
 0x748   :  { %v537_v61 = vrot.slane %v458_v2, 2 }
 0x74a   :  { %v539_v5 = vadd.f32 %v537_v61, %v1512_v8 }
 0x74c   :  { %v1295_v63 = vpop.eup %1294  ;;  %1298 = vtanh.f32 %v539_v5  ;;  %v540_v15 = vmul.f32 0.5, %v539_v5 }
 0x74d   :  { %v507_v9 = vadd.f32 1.0, %v1295_v63  ;;  %v1297_v13 = vpop.eup %1296 }
 0x74e   :  { %1300 = vtanh.f32 %v540_v15 }
 0x74f   :  { %v509_v12 = vmul.f32 0.5, %v507_v9  ;;  %1302 = vtanh.f32 %v504_v18 }
 0x751   :  { %v513_v10 = vmul.f32 %v1297_v13, %v509_v12  ;;  %v512_v54 = vmul.f32 %v509_v12, %v1815_v1  ;;  %v546_v1 = vrot.slane %v1823_v62, 6 }
 0x752   :  { %v1299_v14 = vpop.eup %1298 }
 0x753   :  { %515 = vrot.lane.b32.xlu0 %v513_v10, %s1433_s1  ;;  %550 = vrot.lane.b32.xlu1 %v1299_v14, %s1433_s1 }
 0x754   :  { %v1301_v16 = vpop.eup %1300 }
 0x755   :  { %v542_v53 = vadd.f32 1.0, %v1301_v16  ;;  %v1303_v58 = vpop.eup %1302 }
 0x756   :  { %v508_v61 = vadd.f32 1.0, %v1303_v58 }
 0x757   :  { %v543_v8 = vmul.f32 0.5, %v542_v53 }
 0x758   :  { %v510_v5 = vmul.f32 0.5, %v508_v61 }
 0x759   :  { %v548_v12 = vmul.f32 %v546_v1, %v543_v8 }
 0x7c5   :  { %v516_v11 = vpop.permute.xlu0 %515  ;;  %v551_v17 = vpop.permute.xlu1 %550 }
 0x7c6   :  { %v1874_v59 = vadd.f32 %v516_v11, %v512_v54  ;;  %v553_v2 = vmul.f32 %v551_v17, %v543_v8 }
 0x7c8   :  { %1304 = vtanh.f32 %v1874_v59  ;;  %555 = vrot.lane.b32.xlu2 %v553_v2, %s1434_s2 }
 0x7ce   :  { %v1305_v63 = vpop.eup %1304 }
 0x7cf   :  { %v1878_v60 = vmul.f32 %v1305_v63, %v510_v5 }
 0x7d1   :  { %v570_v9 = vrot.slane %v1878_v60, 2 }
 0x7d3   :  { %571 = vrot.lane.b32.xlu0 %v570_v9, %s1435_s4 }
 0x822   :  { %v556_v13 = vpop.permute.xlu2 %555 }
 0x823   :  { %v1883_v10 = vadd.f32 %v556_v13, %v548_v12 }
 0x825   :  { %1306 = vtanh.f32 %v1883_v10  ;;  %v681_v12 = vrot.slane %v1883_v10, 6  ;;  %v1372_v10 = vld [vmem:[#allocation3 + $0x118] sm:$0xff] }
 0x82b   :  { %v1307_v14 = vpop.eup %1306 }
 0x82c   :  { %561 = vrot.lane.b32.xlu1 %v1307_v14, %s1433_s1 }
 0x845   :  { %v572_v16 = vpop.permute.xlu0 %571 }
 0x89e   :  { %v562_v15 = vpop.permute.xlu1 %561 }
 0x89f   :  { %v564_v18 = vmul.f32 %v562_v15, %v543_v8 }
 0x8a1   :  { %566 = vrot.lane.b32.xlu2 %v564_v18, %s1434_s2 }
 0x8fb   :  { %v567_v53 = vpop.permute.xlu2 %566 }
 0x8fc   :  { %v574_v54 = vsel %vm94_vm0, %v567_v53, %v572_v16 }
 0x8fd   :  { %v576_v11 = vrot.slane %v574_v54, 6 }
 0x8ff   :  { %1229 = vmatmul.msk.f32.vlgmr.msra.gmra.mxu2 %vm151_vm1, %v576_v11  ;;  %1230 = vmatmul.msk.f32.vlgmr.msra.gmra.mxu3 %vm151_vm1, %v576_v11 }
 0x900   :  { %1231 = vmatmul.msk.f32.vlgmr.msrb.gmra.mxu0 %vm151_vm1, %v576_v11  ;;  %894 = vmatpush.msra.mxu2 %v1530_v22 }
 0x901   :  { %992 = vmatpush.msra.mxu3 %v1526_v20  ;;  %1012 = vmatpush.msrb.mxu0 %v1528_v21  ;;  %v1930_v20 = vadd.f32 %v1509_v6, %v1806_v19 }
 0x902   :  { %895 = vmatpush.msra.mxu2 %v1538_v25 }
 0x903   :  { %993 = vmatpush.msra.mxu3 %v1534_v23  ;;  %1013 = vmatpush.msrb.mxu0 %v1536_v24 }
 0x904   :  { %896 = vmatpush.msra.mxu2 %v1548_v28 }
 0x905   :  { %994 = vmatpush.msra.mxu3 %v1541_v26  ;;  %1014 = vmatpush.msrb.mxu0 %v1543_v27 }
 0x906   :  { %897 = vmatpush.msra.mxu2 %v1558_v31 }
 0x907   :  { %995 = vmatpush.msra.mxu3 %v1551_v29  ;;  %1015 = vmatpush.msrb.mxu0 %v1553_v30 }
 0x908   :  { %898 = vmatpush.msra.mxu2 %v1568_v34 }
 0x909   :  { %996 = vmatpush.msra.mxu3 %v1561_v32  ;;  %1016 = vmatpush.msrb.mxu0 %v1563_v33 }
 0x90a   :  { %899 = vmatpush.msra.mxu2 %v1578_v37 }
 0x90b   :  { %997 = vmatpush.msra.mxu3 %v1571_v35  ;;  %1017 = vmatpush.msrb.mxu0 %v1573_v36 }
 0x90c   :  { %900 = vmatpush.msra.mxu2 %v1588_v40 }
 0x90d   :  { %998 = vmatpush.msra.mxu3 %v1581_v38  ;;  %1018 = vmatpush.msrb.mxu0 %v1583_v39 }
 0x90e   :  { %901 = vmatpush.msra.mxu2 %v1598_v43 }
 0x90f   :  { %999 = vmatpush.msra.mxu3 %v1591_v41  ;;  %1019 = vmatpush.msrb.mxu0 %v1593_v42 }
 0x910   :  { %902 = vmatpush.msra.mxu2 %v1608_v46 }
 0x911   :  { %1000 = vmatpush.msra.mxu3 %v1601_v44  ;;  %1020 = vmatpush.msrb.mxu0 %v1603_v45 }
 0x912   :  { %903 = vmatpush.msra.mxu2 %v1618_v49 }
 0x913   :  { %1001 = vmatpush.msra.mxu3 %v1611_v47  ;;  %1021 = vmatpush.msrb.mxu0 %v1613_v48 }
 0x914   :  { %904 = vmatpush.msra.mxu2 %v1628_v52 }
 0x915   :  { %1002 = vmatpush.msra.mxu3 %v1621_v50  ;;  %1022 = vmatpush.msrb.mxu0 %v1623_v51 }
 0x916   :  { %905 = vmatpush.msra.mxu2 %v1642_v57 }
 0x917   :  { %1003 = vmatpush.msra.mxu3 %v1638_v55  ;;  %1023 = vmatpush.msrb.mxu0 %v1640_v56 }
 0x97d   :  { %v636_v25 = vpop.f32.mrf.mxu0 }
 0x97e   :  { %v640_v27 = vadd.f32 %v636_v25, %v1743_v3  ;;  %v1377_v25 = vld [vmem:[#allocation3 + $0xe8] sm:$0xff] }
 0x980   :  { %v642_v19 = vmul.f32 0.5, %v640_v27 }
 0x982   :  { %v596_v21 = vpop.f32.mrf.mxu2  ;;  %v616_v22 = vpop.f32.mrf.mxu3 }
 0x983   :  { %v674_v23 = vadd.f32 %v596_v21, %v1930_v20  ;;  %v639_v24 = vadd.f32 %v616_v22, %v1740_v0  ;;  %v1373_v21 = vld [vmem:[#allocation3 + $0x110] sm:$0xff]  ;;  %v1374_v22 = vld [vmem:[#allocation3 + $0x100] sm:$0xff] }
 0x985   :  { %1308 = vtanh.f32 %v674_v23  ;;  %v641_v26 = vmul.f32 0.5, %v639_v24  ;;  %v675_v44 = vmul.f32 0.5, %v674_v23  ;;  %v1375_v23 = vld [vmem:[#allocation3 + $0xf8] sm:$0xff]  ;;  %v1376_v24 = vld [vmem:[#allocation3 + $0xe0] sm:$0xff] }
 0x987   :  { %1310 = vtanh.f32 %v641_v26 }
 0x988   :  { %1312 = vtanh.f32 %v640_v27 }
 0x989   :  { %1314 = vtanh.f32 %v675_v44 }
 0x98a   :  { %1316 = vtanh.f32 %v642_v19 }
 0x98b   :  { %v1309_v29 = vpop.eup %1308 }
 0x98c   :  { %685 = vrot.lane.b32.xlu1 %v1309_v29, %s1433_s1 }
 0x98d   :  { %v1311_v32 = vpop.eup %1310 }
 0x98e   :  { %v645_v35 = vadd.f32 1.0, %v1311_v32  ;;  %v1313_v38 = vpop.eup %1312 }
 0x98f   :  { %v1315_v47 = vpop.eup %1314 }
 0x990   :  { %v647_v6 = vmul.f32 0.5, %v645_v35  ;;  %v677_v50 = vadd.f32 1.0, %v1315_v47  ;;  %v1317_v2 = vpop.eup %1316 }
 0x991   :  { %v646_v5 = vadd.f32 1.0, %v1317_v2 }
 0x992   :  { %v651_v41 = vmul.f32 %v1313_v38, %v647_v6  ;;  %v678_v55 = vmul.f32 0.5, %v677_v50  ;;  %v650_v17 = vmul.f32 %v647_v6, %v1874_v59 }
 0x993   :  { %v648_v63 = vmul.f32 0.5, %v646_v5 }
 0x994   :  { %653 = vrot.lane.b32.xlu0 %v651_v41, %s1433_s1  ;;  %v683_v13 = vmul.f32 %v681_v12, %v678_v55 }
 0x9fe   :  { %v686_v62 = vpop.permute.xlu1 %685 }
 0x9ff   :  { %v688_v8 = vmul.f32 %v686_v62, %v678_v55 }
 0xa01   :  { %690 = vrot.lane.b32.xlu2 %v688_v8, %s1434_s2 }
 0xa06   :  { %v654_v58 = vpop.permute.xlu0 %653 }
 0xa07   :  { %v1939_v61 = vadd.f32 %v654_v58, %v650_v17 }
 0xa09   :  { %1318 = vtanh.f32 %v1939_v61 }
 0xa0f   :  { %v1319_v9 = vpop.eup %1318 }
 0xa10   :  { %v1942_v1 = vmul.f32 %v1319_v9, %v648_v63 }
 0xa12   :  { %705 = vrot.lane.b32.xlu0 %v1942_v1, %s1435_s4 }
 0xa5b   :  { %v691_v14 = vpop.permute.xlu2 %690 }
 0xa5c   :  { %v1947_v15 = vadd.f32 %v691_v14, %v683_v13 }
 0xa5e   :  { %1320 = vtanh.f32 %v1947_v15 }
 0xa64   :  { %v1321_v59 = vpop.eup %1320 }
 0xa65   :  { %696 = vrot.lane.b32.xlu1 %v1321_v59, %s1433_s1 }
 0xa84   :  { %v706_v53 = vpop.permute.xlu0 %705 }
 0xad7   :  { %v697_v18 = vpop.permute.xlu1 %696 }
 0xad8   :  { %v699_v16 = vmul.f32 %v697_v18, %v678_v55  ;;  %v817_v55 = vrot.slane %v1947_v15, 6 }
 0xada   :  { %701 = vrot.lane.b32.xlu2 %v699_v16, %s1434_s2 }
 0xb34   :  { %v702_v54 = vpop.permute.xlu2 %701 }
 0xb35   :  { %v708_v11 = vsel %vm94_vm0, %v702_v54, %v706_v53 }
 0xb36   :  { %1232 = vmatmul.msk.f32.vlgmr.msrb.gmra.mxu1 %vm151_vm1, %v708_v11  ;;  %1233 = vmatmul.msk.f32.vlgmr.msrb.gmra.mxu2 %vm151_vm1, %v708_v11 }
 0xb37   :  { %1234 = vmatmul.msk.f32.vlgmr.msrb.gmra.mxu3 %vm151_vm1, %v708_v11  ;;  %1032 = vmatpush.msrb.mxu1 %v1372_v10 }
 0xb38   :  { %1130 = vmatpush.msrb.mxu2 %v1373_v21  ;;  %1150 = vmatpush.msrb.mxu3 %v1372_v10 }
 0xb39   :  { %1033 = vmatpush.msrb.mxu1 %v1374_v22 }
 0xb3a   :  { %1131 = vmatpush.msrb.mxu2 %v1375_v23  ;;  %1151 = vmatpush.msrb.mxu3 %v1374_v22 }
 0xb3b   :  { %1034 = vmatpush.msrb.mxu1 %v1548_v28 }
 0xb3c   :  { %1132 = vmatpush.msrb.mxu2 %v1376_v24  ;;  %1152 = vmatpush.msrb.mxu3 %v1377_v25 }
 0xb3d   :  { %1035 = vmatpush.msrb.mxu1 %v1558_v31 }
 0xb3e   :  { %1133 = vmatpush.msrb.mxu2 %v1553_v30  ;;  %1153 = vmatpush.msrb.mxu3 %v1558_v31 }
 0xb3f   :  { %1036 = vmatpush.msrb.mxu1 %v1568_v34 }
 0xb40   :  { %1134 = vmatpush.msrb.mxu2 %v1563_v33  ;;  %1154 = vmatpush.msrb.mxu3 %v1568_v34 }
 0xb41   :  { %1037 = vmatpush.msrb.mxu1 %v1578_v37 }
 0xb42   :  { %1135 = vmatpush.msrb.mxu2 %v1573_v36  ;;  %1155 = vmatpush.msrb.mxu3 %v1578_v37 }
 0xb43   :  { %1038 = vmatpush.msrb.mxu1 %v1588_v40 }
 0xb44   :  { %1136 = vmatpush.msrb.mxu2 %v1583_v39  ;;  %1156 = vmatpush.msrb.mxu3 %v1588_v40 }
 0xb45   :  { %1039 = vmatpush.msrb.mxu1 %v1598_v43 }
 0xb46   :  { %1137 = vmatpush.msrb.mxu2 %v1593_v42  ;;  %1157 = vmatpush.msrb.mxu3 %v1598_v43 }
 0xb47   :  { %1040 = vmatpush.msrb.mxu1 %v1608_v46 }
 0xb48   :  { %1138 = vmatpush.msrb.mxu2 %v1603_v45  ;;  %1158 = vmatpush.msrb.mxu3 %v1608_v46 }
 0xb49   :  { %1041 = vmatpush.msrb.mxu1 %v1618_v49 }
 0xb4a   :  { %1139 = vmatpush.msrb.mxu2 %v1613_v48  ;;  %1159 = vmatpush.msrb.mxu3 %v1618_v49 }
 0xb4b   :  { %1042 = vmatpush.msrb.mxu1 %v1628_v52 }
 0xb4c   :  { %1140 = vmatpush.msrb.mxu2 %v1623_v51  ;;  %1160 = vmatpush.msrb.mxu3 %v1628_v52 }
 0xb4d   :  { %1043 = vmatpush.msrb.mxu1 %v1642_v57 }
 0xb4e   :  { %1141 = vmatpush.msrb.mxu2 %v1640_v56  ;;  %1161 = vmatpush.msrb.mxu3 %v1642_v57 }
 0xbb3   :  { %v729_v28 = vpop.f32.mrf.mxu1 }
 0xbb4   :  { %v808_v30 = vrot.slane %v729_v28, 6 }
 0xbb6   :  { %v810_v31 = vadd.f32 %v808_v30, %v1930_v20 }
 0xbb8   :  { %1322 = vtanh.f32 %v810_v31  ;;  %v811_v49 = vmul.f32 0.5, %v810_v31 }
 0xbb9   :  { %v749_v33 = vpop.f32.mrf.mxu2 }
 0xbba   :  { %v772_v34 = vadd.f32 %v749_v33, %v1740_v0  ;;  %v769_v36 = vpop.f32.mrf.mxu3 }
 0xbbb   :  { %v773_v40 = vadd.f32 %v769_v36, %v1743_v3 }
 0xbbc   :  { %v774_v37 = vmul.f32 0.5, %v772_v34 }
 0xbbd   :  { %v775_v27 = vmul.f32 0.5, %v773_v40 }
 0xbbe   :  { %v1323_v39 = vpop.eup %1322  ;;  %1324 = vtanh.f32 %v774_v37 }
 0xbbf   :  { %821 = vrot.lane.b32.xlu1 %v1323_v39, %s1433_s1  ;;  %1326 = vtanh.f32 %v773_v40 }
 0xbc0   :  { %1328 = vtanh.f32 %v811_v49 }
 0xbc1   :  { %1330 = vtanh.f32 %v775_v27 }
 0xbc4   :  { %v1325_v42 = vpop.eup %1324 }
 0xbc5   :  { %v778_v43 = vadd.f32 1.0, %v1325_v42  ;;  %v1327_v46 = vpop.eup %1326 }
 0xbc6   :  { %v1329_v51 = vpop.eup %1328 }
 0xbc7   :  { %v780_v45 = vmul.f32 0.5, %v778_v43  ;;  %v813_v52 = vadd.f32 1.0, %v1329_v51  ;;  %v1331_v35 = vpop.eup %1330 }
 0xbc8   :  { %v779_v38 = vadd.f32 1.0, %v1331_v35 }
 0xbc9   :  { %v784_v48 = vmul.f32 %v1327_v46, %v780_v45  ;;  %v814_v56 = vmul.f32 0.5, %v813_v52  ;;  %v783_v29 = vmul.f32 %v780_v45, %v1939_v61 }
 0xbca   :  { %v781_v41 = vmul.f32 0.5, %v779_v38 }
 0xbcb   :  { %786 = vrot.lane.b32.xlu0 %v784_v48, %s1433_s1  ;;  %v819_v19 = vmul.f32 %v817_v55, %v814_v56 }
 0xc31   :  { %v822_v57 = vpop.permute.xlu1 %821 }
 0xc32   :  { %v824_v26 = vmul.f32 %v822_v57, %v814_v56 }
 0xc34   :  { %826 = vrot.lane.b32.xlu2 %v824_v26, %s1434_s2 }
 0xc3d   :  { %v787_v32 = vpop.permute.xlu0 %786 }
 0xc3e   :  { %v789_v6 = vadd.f32 %v787_v32, %v783_v29 }
 0xc40   :  { %1332 = vtanh.f32 %v789_v6 }
 0xc46   :  { %v1333_v44 = vpop.eup %1332 }
 0xc47   :  { %v1991_v47 = vmul.f32 %v1333_v44, %v781_v41 }
 0xc49   :  { %v841_v50 = vrot.slane %v1991_v47, 6 }
 0xc4b   :  { %842 = vrot.lane.b32.xlu0 %v841_v50, %s1435_s4 }
 0xc8e   :  { %v827_v62 = vpop.permute.xlu2 %826 }
 0xc8f   :  { %v829_v8 = vadd.f32 %v827_v62, %v819_v19 }
 0xc91   :  { %1334 = vtanh.f32 %v829_v8  ;;  %v955_v49 = vrot.slane %v829_v8, 6 }
 0xc97   :  { %v1335_v17 = vpop.eup %1334 }
 0xc98   :  { %832 = vrot.lane.b32.xlu1 %v1335_v17, %s1433_s1 }
 0xcbd   :  { %v843_v61 = vpop.permute.xlu0 %842 }
 0xd0a   :  { %v833_v58 = vpop.permute.xlu1 %832 }
 0xd0b   :  { %v835_v2 = vmul.f32 %v833_v58, %v814_v56 }
 0xd0d   :  { %837 = vrot.lane.b32.xlu2 %v835_v2, %s1434_s2 }
 0xd67   :  { %v838_v5 = vpop.permute.xlu2 %837 }
 0xd68   :  { %v845_v63 = vsel %vm94_vm0, %v838_v5, %v843_v61 }
 0xd69   :  { %v847_v9 = vrot.slane %v845_v63, 2 }
 0xd6b   :  { %1235 = vmatmul.msk.f32.vlgmr.msra.gmra.mxu0 %vm151_vm1, %v847_v9  ;;  %1236 = vmatmul.msk.f32.vlgmr.msra.gmra.mxu1 %vm151_vm1, %v847_v9 }
 0xd6c   :  { %1237 = vmatmul.msk.f32.vlgmr.msra.gmra.mxu2 %vm151_vm1, %v847_v9 }
 0xde8   :  { %v867_v12 = vpop.f32.mrf.mxu0  ;;  %v887_v13 = vpop.f32.mrf.mxu1 }
 0xde9   :  { %v946_v14 = vrot.slane %v867_v12, 4  ;;  %v910_v15 = vadd.f32 %v887_v13, %v1740_v0 }
 0xdeb   :  { %v948_v59 = vadd.f32 %v946_v14, %v1930_v20  ;;  %v912_v18 = vmul.f32 0.5, %v910_v15 }
 0xded   :  { %1336 = vtanh.f32 %v948_v59  ;;  %v949_v24 = vmul.f32 0.5, %v948_v59 }
 0xdee   :  { %1338 = vtanh.f32 %v912_v18 }
 0xdef   :  { %v907_v16 = vpop.f32.mrf.mxu2 }
 0xdf0   :  { %v911_v53 = vadd.f32 %v907_v16, %v1743_v3 }
 0xdf2   :  { %1340 = vtanh.f32 %v911_v53  ;;  %v913_v30 = vmul.f32 0.5, %v911_v53 }
 0xdf3   :  { %v1337_v54 = vpop.eup %1336  ;;  %1342 = vtanh.f32 %v949_v24 }
 0xdf4   :  { %v1339_v11 = vpop.eup %1338  ;;  %959 = vrot.lane.b32.xlu1 %v1337_v54, %s1433_s1  ;;  %1344 = vtanh.f32 %v913_v30 }
 0xdf5   :  { %v916_v10 = vadd.f32 1.0, %v1339_v11 }
 0xdf7   :  { %v918_v21 = vmul.f32 0.5, %v916_v10 }
 0xdf8   :  { %v1341_v22 = vpop.eup %1340 }
 0xdf9   :  { %v922_v23 = vmul.f32 %v1341_v22, %v918_v21  ;;  %v1343_v25 = vpop.eup %1342  ;;  %v921_v36 = vmul.f32 %v918_v21, %v789_v6 }
 0xdfa   :  { %v951_v28 = vadd.f32 1.0, %v1343_v25  ;;  %v1345_v39 = vpop.eup %1344 }
 0xdfb   :  { %924 = vrot.lane.b32.xlu0 %v922_v23, %s1433_s1  ;;  %v917_v42 = vadd.f32 1.0, %v1345_v39 }
 0xdfc   :  { %v952_v31 = vmul.f32 0.5, %v951_v28 }
 0xdfd   :  { %v919_v43 = vmul.f32 0.5, %v917_v42 }
 0xdfe   :  { %v957_v51 = vmul.f32 %v955_v49, %v952_v31 }
 0xe66   :  { %v960_v33 = vpop.permute.xlu1 %959 }
 0xe67   :  { %v962_v34 = vmul.f32 %v960_v33, %v952_v31  ;;  %v1258_v33 = vld [vmem:[%s2095_s5] ss:$0 sm:$0xff]  ;;  %s1436_s5 = smov 1  }
 0xe69   :  { %964 = vrot.lane.b32.xlu2 %v962_v34, %s1434_s2 }
 0xe6d   :  { %v925_v37 = vpop.permute.xlu0 %924 }
 0xe6e   :  { %v927_v40 = vadd.f32 %v925_v37, %v921_v36 }
 0xe70   :  { %1346 = vtanh.f32 %v927_v40 }
 0xe76   :  { %v1347_v45 = vpop.eup %1346 }
 0xe77   :  { %v2008_v46 = vmul.f32 %v1347_v45, %v919_v43 }
 0xe79   :  { %v979_v48 = vrot.slane %v2008_v46, 4 }
 0xe7b   :  { %980 = vrot.lane.b32.xlu0 %v979_v48, %s1435_s4 }
 0xec3   :  { %v965_v52 = vpop.permute.xlu2 %964 }
 0xec4   :  { %v967_v56 = vadd.f32 %v965_v52, %v957_v51 }
 0xec6   :  { %1348 = vtanh.f32 %v967_v56  ;;  %v1093_v24 = vrot.slane %v967_v56, 6  ;;  %v2053_v56 = vld [vmem:[#allocation2] ss:$0 sm:$0xff] }
 0xecc   :  { %v1349_v57 = vpop.eup %1348 }
 0xecd   :  { %970 = vrot.lane.b32.xlu1 %v1349_v57, %s1433_s1 }
 0xeed   :  { %v981_v29 = vpop.permute.xlu0 %980 }
 0xf3f   :  { %v971_v26 = vpop.permute.xlu1 %970 }
 0xf40   :  { %v973_v27 = vmul.f32 %v971_v26, %v952_v31 }
 0xf42   :  { %975 = vrot.lane.b32.xlu2 %v973_v27, %s1434_s2 }
 0xf9c   :  { %v976_v32 = vpop.permute.xlu2 %975 }
 0xf9d   :  { %v983_v35 = vsel %vm94_vm0, %v976_v32, %v981_v29 }
 0xf9e   :  { %v985_v6 = vrot.slane %v983_v35, 4 }
 0xfa0   :  { %1238 = vmatmul.msk.f32.vlgmr.msra.gmra.mxu3 %vm151_vm1, %v985_v6  ;;  %1239 = vmatmul.msk.f32.vlgmr.msrb.gmra.mxu0 %vm151_vm1, %v985_v6 }
 0xfa1   :  { %1240 = vmatmul.msk.f32.vlgmr.msrb.gmra.mxu1 %vm151_vm1, %v985_v6 }
0x101d   :  { %v1025_v38 = vpop.f32.mrf.mxu0 }
0x101e   :  { %v1048_v41 = vadd.f32 %v1025_v38, %v1740_v0  ;;  %v1045_v44 = vpop.f32.mrf.mxu1 }
0x101f   :  { %v1049_v55 = vadd.f32 %v1045_v44, %v1743_v3 }
0x1020   :  { %v1050_v50 = vmul.f32 0.5, %v1048_v41 }
0x1021   :  { %v1051_v12 = vmul.f32 0.5, %v1049_v55 }
0x1022   :  { %1350 = vtanh.f32 %v1050_v50 }
0x1023   :  { %v1005_v19 = vpop.f32.mrf.mxu3  ;;  %1352 = vtanh.f32 %v1049_v55 }
0x1024   :  { %v1084_v62 = vrot.slane %v1005_v19, 2 }
0x1026   :  { %v1086_v8 = vadd.f32 %v1084_v62, %v1930_v20 }
0x1028   :  { %v1351_v17 = vpop.eup %1350  ;;  %1354 = vtanh.f32 %v1086_v8  ;;  %v1087_v9 = vmul.f32 0.5, %v1086_v8 }
0x1029   :  { %v1054_v58 = vadd.f32 1.0, %v1351_v17  ;;  %v1353_v61 = vpop.eup %1352 }
0x102a   :  { %1356 = vtanh.f32 %v1087_v9 }
0x102b   :  { %v1056_v2 = vmul.f32 0.5, %v1054_v58  ;;  %1358 = vtanh.f32 %v1051_v12 }
0x102d   :  { %v1060_v5 = vmul.f32 %v1353_v61, %v1056_v2  ;;  %v1059_v15 = vmul.f32 %v1056_v2, %v927_v40 }
0x102e   :  { %v1355_v63 = vpop.eup %1354 }
0x102f   :  { %1062 = vrot.lane.b32.xlu0 %v1060_v5, %s1433_s1  ;;  %1097 = vrot.lane.b32.xlu1 %v1355_v63, %s1433_s1 }
0x1030   :  { %v1357_v13 = vpop.eup %1356 }
0x1031   :  { %v1089_v14 = vadd.f32 1.0, %v1357_v13  ;;  %v1359_v16 = vpop.eup %1358 }
0x1032   :  { %v1055_v11 = vadd.f32 1.0, %v1359_v16 }
0x1033   :  { %v1090_v59 = vmul.f32 0.5, %v1089_v14 }
0x1034   :  { %v1057_v10 = vmul.f32 0.5, %v1055_v11 }
0x1035   :  { %v1095_v25 = vmul.f32 %v1093_v24, %v1090_v59 }
0x10a1   :  { %v1063_v20 = vpop.permute.xlu0 %1062  ;;  %v1098_v18 = vpop.permute.xlu1 %1097 }
0x10a2   :  { %v2023_v53 = vadd.f32 %v1063_v20, %v1059_v15  ;;  %v1100_v54 = vmul.f32 %v1098_v18, %v1090_v59 }
0x10a4   :  { %1360 = vtanh.f32 %v2023_v53  ;;  %1102 = vrot.lane.b32.xlu2 %v1100_v54, %s1434_s2 }
0x10aa   :  { %v1361_v21 = vpop.eup %1360 }
0x10ab   :  { %v2027_v22 = vmul.f32 %v1361_v21, %v1057_v10 }
0x10ad   :  { %v1117_v23 = vrot.slane %v2027_v22, 2 }
0x10af   :  { %1118 = vrot.lane.b32.xlu0 %v1117_v23, %s1435_s4 }
0x10fe   :  { %v1103_v28 = vpop.permute.xlu2 %1102 }
0x10ff   :  { %v1105_v30 = vadd.f32 %v1103_v28, %v1095_v25 }
0x1101   :  { %1362 = vtanh.f32 %v1105_v30 }
0x1107   :  { %v1363_v31 = vpop.eup %1362 }
0x1108   :  { %1108 = vrot.lane.b32.xlu1 %v1363_v31, %s1433_s1 }
0x1110   :  { %242 = vrot.lane.b32.xlu1 %v1258_v33, %s1433_s1 }
0x1121   :  { %v1119_v42 = vpop.permute.xlu0 %1118 }
0x117a   :  { %v1109_v34 = vpop.permute.xlu1 %1108 }
0x117b   :  { %v1111_v36 = vmul.f32 %v1109_v34, %v1090_v59 }
0x117d   :  { %1113 = vrot.lane.b32.xlu2 %v1111_v36, %s1434_s2 }
0x1182   :  { %v2037_v37 = vpop.permute.xlu1 %242 }
0x1183   :  { %v245_v39 = vmul.f32 %v2037_v37, %v1752_v4  ;;  %v383_v40 = vmul.f32 %v1818_v7, %v2037_v37  ;;  %v659_v52 = vmul.f32 %v1942_v1, %v2037_v37  ;;  %v521_v50 = vmul.f32 %v1878_v60, %v2037_v37 }
0x1184   :  { %v930_v14 = vmul.f32 %v2008_v46, %v2037_v37  ;;  %v792_v20 = vmul.f32 %v1991_v47, %v2037_v37  ;;  %v1068_v18 = vmul.f32 %v2027_v22, %v2037_v37 }
0x1185   :  { %247 = vrot.lane.b32.xlu2 %v245_v39, %s1433_s1  ;;  %385 = vrot.lane.b32.xlu1 %v383_v40, %s1433_s1 }
0x11d7   :  { %v1114_v43 = vpop.permute.xlu2 %1113 }
0x11d8   :  { %v1121_v45 = vsel %vm94_vm0, %v1114_v43, %v1119_v42 }
0x11d9   :  { %v1123_v48 = vrot.slane %v1121_v45, 6 }
0x11db   :  { %1241 = vmatmul.msk.f32.vlgmr.msrb.gmra.mxu2 %vm151_vm1, %v1123_v48  ;;  %1242 = vmatmul.msk.f32.vlgmr.msrb.gmra.mxu3 %vm151_vm1, %v1123_v48 }
0x11df   :  { %v248_v49 = vpop.permute.xlu2 %247 }
0x11e0   :  { %v251_v4 = vsel %vm250_vm2, %v248_v49, 0.0 }
0x11e1   :  { %252 = vadd.xlane.f32.xlu0 %v251_v4 }
0x11f7   :  { %v386_v51 = vpop.permute.xlu1 %385 }
0x11f8   :  { %v388_v7 = vsel %vm250_vm2, %v386_v51, 0.0 }
0x11f9   :  { %389 = vadd.xlane.f32.xlu1 %v388_v7 }
0x1212   :  { %661 = vrot.lane.b32.xlu1 %v659_v52, %s1433_s1 }
0x1254   :  { %v253_v57 = vpop.xlane.xlu0 %252 }
0x1255   :  { %v257_v26 = vadd.f32 %v2053_v56, %v253_v57 }
0x1257   :  { %259 = vst.msk [vmem:[#allocation6] sm:$0x3] %vm258_vm3, %v257_v26 }
0x125e   :  { %v1143_v27 = vpop.f32.mrf.mxu2  ;;  %v1163_v38 = vpop.f32.mrf.mxu3 }
0x125f   :  { %v1166_v29 = vadd.f32 %v1143_v27, %v1740_v0  ;;  %v1167_v41 = vadd.f32 %v1163_v38, %v1743_v3 }
0x1261   :  { %v1168_v32 = vmul.f32 0.5, %v1166_v29  ;;  %v1169_v8 = vmul.f32 0.5, %v1167_v41 }
0x1263   :  { %1364 = vtanh.f32 %v1168_v32 }
0x1264   :  { %1366 = vtanh.f32 %v1167_v41 }
0x1265   :  { %1368 = vtanh.f32 %v1169_v8 }
0x1269   :  { %v1365_v1 = vpop.eup %1364 }
0x126a   :  { %v1172_v44 = vadd.f32 1.0, %v1365_v1  ;;  %v1367_v0 = vpop.eup %1366 }
0x126b   :  { %v1369_v2 = vpop.eup %1368 }
0x126c   :  { %v390_v35 = vpop.xlane.xlu1 %389  ;;  %v1174_v55 = vmul.f32 0.5, %v1172_v44  ;;  %v1173_v5 = vadd.f32 1.0, %v1369_v2 }
0x126d   :  { %v391_v6 = vadd.f32 %v2053_v56, %v390_v35 }
0x126e   :  { %v1178_v19 = vmul.f32 %v1367_v0, %v1174_v55  ;;  %v1177_v3 = vmul.f32 %v1174_v55, %v2023_v53  ;;  %v1175_v63 = vmul.f32 0.5, %v1173_v5 }
0x126f   :  { %393 = vrot.lane.b32.xlu2 %v391_v6, %s1436_s5 }
0x1277   :  { %523 = vrot.lane.b32.xlu2 %v521_v50, %s1433_s1 }
0x127f   :  { %1180 = vrot.lane.b32.xlu2 %v1178_v19, %s1433_s1 }
0x1284   :  { %v662_v16 = vpop.permute.xlu1 %661 }
0x1285   :  { %v664_v46 = vsel %vm250_vm2, %v662_v16, 0.0 }
0x12c9   :  { %v394_v62 = vpop.permute.xlu2 %393 }
0x12ca   :  { %397 = vst.msk [vmem:[#allocation6] sm:$0x3] %vm396_vm4, %v394_v62 }
0x12d1   :  { %v524_v17 = vpop.permute.xlu2 %523 }
0x12d2   :  { %v526_v58 = vsel %vm250_vm2, %v524_v17, 0.0 }
0x12d3   :  { %527 = vadd.xlane.f32.xlu2 %v526_v58 }
0x12d9   :  { %v1181_v60 = vpop.permute.xlu2 %1180 }
0x12da   :  { %v1183_v61 = vadd.f32 %v1181_v60, %v1177_v3 }
0x12dc   :  { %1370 = vtanh.f32 %v1183_v61 }
0x12e2   :  { %v1371_v9 = vpop.eup %1370 }
0x12e3   :  { %v1185_v12 = vmul.f32 %v1371_v9, %v1175_v63 }
0x12e5   :  { %v1186_v13 = vmul.f32 %v1185_v12, %v2037_v37 }
0x12e7   :  { %1188 = vrot.lane.b32.xlu1 %v1186_v13, %s1433_s1 }
0x12eb   :  { %932 = vrot.lane.b32.xlu2 %v930_v14, %s1433_s1 }
0x1346   :  { %v528_v15 = vpop.xlane.xlu2 %527 }
0x1347   :  { %v529_v59 = vadd.f32 %v2053_v56, %v528_v15 }
0x1349   :  { %531 = vrot.lane.b32.xlu0 %v529_v59, %s1437_s25 }
0x134e   :  { %v933_v25 = vpop.permute.xlu2 %932 }
0x134f   :  { %v935_v28 = vsel %vm250_vm2, %v933_v25, 0.0 }
0x1351   :  { %794 = vrot.lane.b32.xlu0 %v792_v20, %s1433_s1 }
0x1359   :  { %1070 = vrot.lane.b32.xlu0 %v1068_v18, %s1433_s1  ;;  %v1189_v21 = vpop.permute.xlu1 %1188 }
0x135a   :  { %v1191_v22 = vsel %vm250_vm2, %v1189_v21, 0.0 }
0x1383   :  { %665 = vadd.xlane.f32.xlu0 %v664_v46 }
0x13bb   :  { %v532_v53 = vpop.permute.xlu0 %531 }
0x13bc   :  { %535 = vst.msk [vmem:[#allocation6] sm:$0x3] %vm534_vm5, %v532_v53 }
0x13c3   :  { %v795_v54 = vpop.permute.xlu0 %794 }
0x13c4   :  { %v797_v11 = vsel %vm250_vm2, %v795_v54, 0.0 }
0x13c5   :  { %798 = vadd.xlane.f32.xlu2 %v797_v11 }
0x13cb   :  { %v1071_v10 = vpop.permute.xlu0 %1070 }
0x13cc   :  { %v1073_v47 = vsel %vm250_vm2, %v1071_v10, 0.0 }
0x13cd   :  { %1074 = vadd.xlane.f32.xlu0 %v1073_v47 }
0x13d5   :  { %1192 = vadd.xlane.f32.xlu0 %v1191_v22 }
0x13f6   :  { %v666_v23 = vpop.xlane.xlu0 %665 }
0x13f7   :  { %v667_v24 = vadd.f32 %v2053_v56, %v666_v23 }
0x13f9   :  { %669 = vrot.lane.b32.xlu1 %v667_v24, %s1438_s26 }
0x1423   :  { %936 = vadd.xlane.f32.xlu1 %v935_v28 }
0x1438   :  { %v799_v30 = vpop.xlane.xlu2 %798 }
0x1439   :  { %v800_v31 = vadd.f32 %v2053_v56, %v799_v30 }
0x143b   :  { %802 = vrot.lane.b32.xlu2 %v800_v31, %s1439_s27 }
0x1440   :  { %v1075_v33 = vpop.xlane.xlu0 %1074 }
0x1441   :  { %v1076_v34 = vadd.f32 %v2053_v56, %v1075_v33 }
0x1443   :  { %1078 = vrot.lane.b32.xlu0 %v1076_v34, %s1440_s28 }
0x1448   :  { %v1193_v36 = vpop.xlane.xlu0 %1192 }
0x1449   :  { %v1194_v37 = vadd.f32 %v2053_v56, %v1193_v36 }
0x144b   :  { %1196 = vrot.lane.b32.xlu2 %v1194_v37, %s1441_s29 }
0x146b   :  { %v670_v39 = vpop.permute.xlu1 %669 }
0x146c   :  { %673 = vst.msk [vmem:[#allocation6] sm:$0x3] %vm672_vm6, %v670_v39 }
0x1495   :  { %v803_v40 = vpop.permute.xlu2 %802 }
0x1496   :  { %806 = vst.msk [vmem:[#allocation6] sm:$0x3] %vm805_vm7, %v803_v40  ;;  %v937_v42 = vpop.xlane.xlu1 %936 }
0x1497   :  { %v938_v43 = vadd.f32 %v2053_v56, %v937_v42 }
0x1499   :  { %940 = vrot.lane.b32.xlu1 %v938_v43, %s1442_s30 }
0x14a5   :  { %v1197_v49 = vpop.permute.xlu2 %1196 }
0x14b5   :  { %v1079_v48 = vpop.permute.xlu0 %1078 }
0x150b   :  { %v941_v45 = vpop.permute.xlu1 %940 }
0x150c   :  { %944 = vst.msk [vmem:[#allocation6] sm:$0x3] %vm943_vm8, %v941_v45 }
0x150d   :  { %1082 = vst.msk [vmem:[#allocation6] sm:$0x3] %vm1081_vm9, %v1079_v48 }
0x150e   :  { %1200 = vst.msk [vmem:[#allocation6] sm:$0x3] %vm1199_vm10, %v1197_v49 }
0x150f   :  { %1211 = dma.vmem_to_hbm [thread:$0]  %s1207_s9, 32, %s1209_s6, [#allocation5]  }
0x1510   :  { %1428 = dma.done.wait [#allocation5], 32  }
0x1511   :  { %1429 = vsyncadd [#allocation5], 4294967264 }
0x1512   :  { %1216 = vsyncpa [#allocation4], 1 }
0x1513   :  { %1217 = vsyncpa [#allocation5], 1 }

</bundles_post_ra>
